<compile_context>
chip_gen: v6e
topology: v6e:2x2x1
jax: 0.10.0
libtpu: 0.0.40
codegen_flags: <defaults>
</compile_context>

<pallas_src>
import jax
import jax.numpy as jnp
from jax import lax
from jax.experimental import pallas as pl
from jax.experimental.pallas import tpu as pltpu


def _round_up(x, m):
    return (x + m - 1) // m * m


def _graphsage_kernel(src_ref, dst_ref, x_ref, w1_ref, b1_ref, w2_ref, b2_ref,
                      o_ref):
    n_pad = x_ref.shape[0]
    e_pad = src_ref.shape[0]
    h_dim = w1_ref.shape[1] // 2     # padded hidden dim
    o_dim = w2_ref.shape[1] // 2     # padded output dim

    # ---- gather / scatter operators built on-chip from edge ids -------------
    # src_oh[e, n] = 1 iff n == src[e]   (gather operator,  [E, N])
    # dst_oh[n, e] = 1 iff n == dst[e]   (scatter operator, [N, E])
    # Padded edges carry id -1 -> all-zero rows / columns (exact).
    lane_ids = lax.broadcasted_iota(jnp.int32, (e_pad, n_pad), 1)       # [E, N]
    src_oh = (lane_ids == src_ref[...]).astype(jnp.float32)             # [E, N]
    sub_ids = lax.broadcasted_iota(jnp.int32, (n_pad, e_pad), 0)        # [N, E]
    dst_oh = (sub_ids == dst_ref[...]).astype(jnp.float32)              # [N, E]

    # In-degree straight from the scatter operator; rows with deg == 0 stay
    # all-zero after the matmul, so the clamp is exact.
    deg = jnp.sum(dst_oh, axis=-1, keepdims=True)                       # [N, 1]
    inv_deg = pl.reciprocal(jnp.maximum(deg, 1.0), approx=False)        # [N, 1]

    def sage_layer(z, w_cat_ref, b_ref, d_out):
        zw = jnp.dot(z, w_cat_ref[...],
                     preferred_element_type=jnp.float32)                # [N, 2D]
        msg = jnp.dot(src_oh, zw[:, :d_out],
                      preferred_element_type=jnp.float32)               # [E, D]
        agg = jnp.dot(dst_oh, msg,
                      preferred_element_type=jnp.float32)               # [N, D]
        return agg * inv_deg + zw[:, d_out:] + b_ref[0:1, :]

    # ---- layer 1 + ELU -------------------------------------------------------
    h = sage_layer(x_ref[...], w1_ref, b1_ref, h_dim)
    # ELU (alpha=1); clamp the exp argument so the discarded branch stays finite.
    h = jnp.where(h > 0.0, h, jnp.exp(jnp.minimum(h, 0.0)) - 1.0)

    # ---- layer 2 -------------------------------------------------------------
    out = sage_layer(h, w2_ref, b2_ref, o_dim)
    o_ref[...] = out.astype(o_ref.dtype)


@jax.jit
def graphsage_pallas(x, edge_index, w1_l, b1, w1_r, w2_l, b2, w2_r):
    """x: [N, D_in] f32; edge_index: [2, E] int (row 0 = src, row 1 = dst).
    w*_l / w*_r are PyTorch-Linear-style [out, in] weights; b* are [out]."""
    n, d_in = x.shape
    h_dim = w1_l.shape[0]
    d_out = w2_l.shape[0]
    e = edge_index.shape[1]

    # Node count padded to 128 lanes (not 8) so the one-hot lane axis and the
    # gather-matmul K dim are full vregs / full MXU passes.
    n_pad = _round_up(max(n, 1), 128)
    e_pad = _round_up(max(e, 1), 128)
    din_pad = _round_up(d_in, 128)
    h_pad = _round_up(h_dim, 128)
    dout_pad = _round_up(d_out, 128)

    def pad2(a, r, c):
        return jnp.pad(a, ((0, r - a.shape[0]), (0, c - a.shape[1])))

    # Fused, pre-transposed, zero-padded weights: [D_in_pad, 2 * D_out_pad]
    w1_cat = jnp.concatenate([pad2(w1_l.T, din_pad, h_pad),
                              pad2(w1_r.T, din_pad, h_pad)], axis=1)
    w2_cat = jnp.concatenate([pad2(w2_l.T, h_pad, dout_pad),
                              pad2(w2_r.T, h_pad, dout_pad)], axis=1)
    b1_p = jnp.tile(jnp.pad(b1, (0, h_pad - h_dim))[None, :], (8, 1))
    b2_p = jnp.tile(jnp.pad(b2, (0, dout_pad - d_out))[None, :], (8, 1))

    x_p = pad2(x, n_pad, din_pad)

    # Edge ids delivered already in the orientation each one-hot consumes:
    # src as an [E, 1] column (sublane axis = edges), dst as a [1, E] row.
    # Padded edges use id -1 (never matches a node id -> zero one-hot entry).
    src = edge_index[0].astype(jnp.int32)
    dst = edge_index[1].astype(jnp.int32)
    src_p = jnp.full((e_pad, 1), -1, jnp.int32).at[:e, 0].set(src)
    dst_p = jnp.full((1, e_pad), -1, jnp.int32).at[0, :e].set(dst)

    # Explicit scoped-VMEM budget (inputs + intermediates + headroom), capped
    # at the smallest physical VMEM across v5e/v6e/v7x.
    est_bytes = 4 * (
        n_pad * din_pad                       # x
        + 2 * e_pad * n_pad                   # src_oh + dst_oh
        + n_pad * 2 * h_pad                   # zw (layer 1)
        + e_pad * h_pad                       # msg (layer 1)
        + 2 * n_pad * h_pad                   # agg + h
        + n_pad * 2 * dout_pad                # zw (layer 2)
        + e_pad * dout_pad                    # msg (layer 2)
        + 2 * n_pad * dout_pad                # agg + out
        + din_pad * 2 * h_pad + h_pad * 2 * dout_pad   # fused weights
        + 8 * (h_pad + dout_pad) + e_pad + n_pad)      # biases, edge ids, deg
    vmem_limit = int(min(2 * est_bytes + (1 << 20), 64 * 1024 * 1024))

    def full(arr):
        nd = arr.ndim
        return pl.BlockSpec(arr.shape, lambda: (0,) * nd)

    out_pad = pl.pallas_call(
        _graphsage_kernel,
        out_shape=jax.ShapeDtypeStruct((n_pad, dout_pad), jnp.float32),
        grid=(),
        in_specs=[full(src_p), full(dst_p), full(x_p), full(w1_cat), full(b1_p),
                  full(w2_cat), full(b2_p)],
        out_specs=pl.BlockSpec((n_pad, dout_pad), lambda: (0, 0)),
        compiler_params=pltpu.CompilerParams(vmem_limit_bytes=vmem_limit),
    )(src_p, dst_p, x_p, w1_cat, b1_p, w2_cat, b2_p)
    return out_pad[:n, :d_out]


# ----------------------------- pure-JAX reference -----------------------------
def _sage_conv_ref(x, edge_index, w_l, b_l, w_r):
    src, dst = edge_index[0], edge_index[1]
    n = x.shape[0]
    agg = jnp.zeros((n, x.shape[1]), x.dtype).at[dst].add(x[src])
    cnt = jnp.zeros((n, 1), x.dtype).at[dst].add(1.0)
    agg = agg / jnp.maximum(cnt, 1.0)
    return agg @ w_l.T + b_l[None, :] + x @ w_r.T


def _graphsage_ref(x, edge_index, w1_l, b1, w1_r, w2_l, b2, w2_r):
    h = _sage_conv_ref(x, edge_index, w1_l, b1, w1_r)
    h = jax.nn.elu(h)
    return _sage_conv_ref(h, edge_index, w2_l, b2, w2_r)


if __name__ == "__main__":
    num_nodes = 16
    input_dim, hidden_dim, output_dim = 32, 64, 32

    key = jax.random.PRNGKey(0)
    (k_x, k_es, k_ed, k_w1l, k_b1, k_w1r,
     k_w2l, k_b2, k_w2r) = jax.random.split(key, 9)

    x = jax.random.normal(k_x, (num_nodes, input_dim), jnp.float32)

    # Deterministic small graph: ring + skip-2 ring + 16 random edges (E = 48).
    ids = jnp.arange(num_nodes, dtype=jnp.int32)
    src = jnp.concatenate(
        [ids, ids, jax.random.randint(k_es, (16,), 0, num_nodes, jnp.int32)])
    dst = jnp.concatenate(
        [(ids + 1) % num_nodes, (ids + 2) % num_nodes,
         jax.random.randint(k_ed, (16,), 0, num_nodes, jnp.int32)])
    edge_index = jnp.stack([src, dst], axis=0)            # [2, 48]

    def uinit(k, shape, fan_in):
        bound = 1.0 / jnp.sqrt(jnp.float32(fan_in))
        return jax.random.uniform(k, shape, jnp.float32, -bound, bound)

    w1_l = uinit(k_w1l, (hidden_dim, input_dim), input_dim)
    b1 = uinit(k_b1, (hidden_dim,), input_dim)
    w1_r = uinit(k_w1r, (hidden_dim, input_dim), input_dim)
    w2_l = uinit(k_w2l, (output_dim, hidden_dim), hidden_dim)
    b2 = uinit(k_b2, (output_dim,), hidden_dim)
    w2_r = uinit(k_w2r, (output_dim, hidden_dim), hidden_dim)

    out = graphsage_pallas(x, edge_index, w1_l, b1, w1_r, w2_l, b2, w2_r)
    out = jax.block_until_ready(out)

    ref = _graphsage_ref(x, edge_index, w1_l, b1, w1_r, w2_l, b2, w2_r)
    assert out.shape == (num_nodes, output_dim)
    err = jnp.max(jnp.abs(out - ref))
    assert jnp.allclose(out, ref, atol=1e-4, rtol=1e-4), f"mismatch, max err {err}"

    print("KERNEL_OK")
</pallas_src>

<mosaic_0001>
module attributes {stable_mosaic.version = 11 : i64} {
  func.func @_graphsage_kernel(%arg0: memref<128x1xi32, #tpu.memory_space<vmem>>, %arg1: memref<1x128xi32, #tpu.memory_space<vmem>>, %arg2: memref<128x128xf32, #tpu.memory_space<vmem>>, %arg3: memref<128x256xf32, #tpu.memory_space<vmem>>, %arg4: memref<8x128xf32, #tpu.memory_space<vmem>>, %arg5: memref<128x256xf32, #tpu.memory_space<vmem>>, %arg6: memref<8x128xf32, #tpu.memory_space<vmem>>, %arg7: memref<128x128xf32, #tpu.memory_space<vmem>>) attributes {dimension_semantics = [], scalar_prefetch = 0 : i64, scratch_operands = 0 : i64, tpu.core_type = #tpu.core_type<tc>} {
    %0 = tpu.iota {dimensions = array<i32: 1>} : vector<128x128xi32>
    %c0 = arith.constant 0 : index
    %c0_0 = arith.constant 0 : index
    %1 = vector.load %arg0[%c0, %c0_0] : memref<128x1xi32, #tpu.memory_space<vmem>>, vector<128x1xi32>
    %2 = vector.broadcast %1 : vector<128x1xi32> to vector<128x128xi32>
    %3 = arith.cmpi eq, %0, %2 : vector<128x128xi32>
    %4 = arith.extui %3 : vector<128x128xi1> to vector<128x128xi32>
    %5 = arith.sitofp %4 : vector<128x128xi32> to vector<128x128xf32>
    %6 = tpu.iota {dimensions = array<i32: 0>} : vector<128x128xi32>
    %c0_1 = arith.constant 0 : index
    %c0_2 = arith.constant 0 : index
    %7 = vector.load %arg1[%c0_1, %c0_2] : memref<1x128xi32, #tpu.memory_space<vmem>>, vector<1x128xi32>
    %8 = vector.broadcast %7 : vector<1x128xi32> to vector<128x128xi32>
    %9 = arith.cmpi eq, %6, %8 : vector<128x128xi32>
    %10 = arith.extui %9 : vector<128x128xi1> to vector<128x128xi32>
    %11 = arith.sitofp %10 : vector<128x128xi32> to vector<128x128xf32>
    %cst = arith.constant dense<0.000000e+00> : vector<128xf32>
    %12 = vector.multi_reduction <add>, %11, %cst [1] : vector<128x128xf32> to vector<128xf32>
    %13 = vector.shape_cast %12 : vector<128xf32> to vector<128x1xf32>
    %cst_3 = arith.constant 1.000000e+00 : f32
    %14 = vector.broadcast %cst_3 : f32 to vector<128x1xf32>
    %15 = arith.maximumf %13, %14 : vector<128x1xf32>
    %16 = tpu.reciprocal %15 : vector<128x1xf32> -> vector<128x1xf32>
    %c0_4 = arith.constant 0 : index
    %c0_5 = arith.constant 0 : index
    %17 = vector.load %arg2[%c0_4, %c0_5] : memref<128x128xf32, #tpu.memory_space<vmem>>, vector<128x128xf32>
    %c0_6 = arith.constant 0 : index
    %c0_7 = arith.constant 0 : index
    %18 = vector.load %arg3[%c0_6, %c0_7] : memref<128x256xf32, #tpu.memory_space<vmem>>, vector<128x256xf32>
    %cst_8 = arith.constant dense<0.000000e+00> : vector<128x256xf32>
    %19 = tpu.matmul %17, %18, %cst_8 {dimension_numbers = #tpu.dot_dimension_numbers<[1], [0], [0], [1], [0, 0, 1, 1], [], []>} : vector<128x128xf32>, vector<128x256xf32>, vector<128x256xf32> -> vector<128x256xf32>
    %20 = vector.extract_strided_slice %19 {offsets = [0, 0], sizes = [128, 128], strides = [1, 1]} : vector<128x256xf32> to vector<128x128xf32>
    %cst_9 = arith.constant dense<0.000000e+00> : vector<128x128xf32>
    %21 = tpu.matmul %5, %20, %cst_9 {dimension_numbers = #tpu.dot_dimension_numbers<[1], [0], [0], [1], [0, 0, 1, 1], [], []>} : vector<128x128xf32>, vector<128x128xf32>, vector<128x128xf32> -> vector<128x128xf32>
    %cst_10 = arith.constant dense<0.000000e+00> : vector<128x128xf32>
    %22 = tpu.matmul %11, %21, %cst_10 {dimension_numbers = #tpu.dot_dimension_numbers<[1], [0], [0], [1], [0, 0, 1, 1], [], []>} : vector<128x128xf32>, vector<128x128xf32>, vector<128x128xf32> -> vector<128x128xf32>
    %23 = vector.broadcast %16 : vector<128x1xf32> to vector<128x128xf32>
    %24 = arith.mulf %22, %23 : vector<128x128xf32>
    %25 = vector.extract_strided_slice %19 {offsets = [0, 128], sizes = [128, 128], strides = [1, 1]} : vector<128x256xf32> to vector<128x128xf32>
    %26 = arith.addf %24, %25 : vector<128x128xf32>
    %c0_11 = arith.constant 0 : index
    %c0_12 = arith.constant 0 : index
    %27 = vector.load %arg4[%c0_11, %c0_12] : memref<8x128xf32, #tpu.memory_space<vmem>>, vector<1x128xf32>
    %28 = vector.broadcast %27 : vector<1x128xf32> to vector<128x128xf32>
    %29 = arith.addf %26, %28 : vector<128x128xf32>
    %cst_13 = arith.constant 0.000000e+00 : f32
    %30 = vector.broadcast %cst_13 : f32 to vector<128x128xf32>
    %31 = arith.cmpf ogt, %29, %30 : vector<128x128xf32>
    %cst_14 = arith.constant 0.000000e+00 : f32
    %32 = vector.broadcast %cst_14 : f32 to vector<128x128xf32>
    %33 = arith.minimumf %29, %32 : vector<128x128xf32>
    %34 = math.exp %33 : vector<128x128xf32>
    %cst_15 = arith.constant 1.000000e+00 : f32
    %35 = vector.broadcast %cst_15 : f32 to vector<128x128xf32>
    %36 = arith.subf %34, %35 : vector<128x128xf32>
    %37 = arith.select %31, %29, %36 : vector<128x128xi1>, vector<128x128xf32>
    %c0_16 = arith.constant 0 : index
    %c0_17 = arith.constant 0 : index
    %38 = vector.load %arg5[%c0_16, %c0_17] : memref<128x256xf32, #tpu.memory_space<vmem>>, vector<128x256xf32>
    %cst_18 = arith.constant dense<0.000000e+00> : vector<128x256xf32>
    %39 = tpu.matmul %37, %38, %cst_18 {dimension_numbers = #tpu.dot_dimension_numbers<[1], [0], [0], [1], [0, 0, 1, 1], [], []>} : vector<128x128xf32>, vector<128x256xf32>, vector<128x256xf32> -> vector<128x256xf32>
    %40 = vector.extract_strided_slice %39 {offsets = [0, 0], sizes = [128, 128], strides = [1, 1]} : vector<128x256xf32> to vector<128x128xf32>
    %cst_19 = arith.constant dense<0.000000e+00> : vector<128x128xf32>
    %41 = tpu.matmul %5, %40, %cst_19 {dimension_numbers = #tpu.dot_dimension_numbers<[1], [0], [0], [1], [0, 0, 1, 1], [], []>} : vector<128x128xf32>, vector<128x128xf32>, vector<128x128xf32> -> vector<128x128xf32>
    %cst_20 = arith.constant dense<0.000000e+00> : vector<128x128xf32>
    %42 = tpu.matmul %11, %41, %cst_20 {dimension_numbers = #tpu.dot_dimension_numbers<[1], [0], [0], [1], [0, 0, 1, 1], [], []>} : vector<128x128xf32>, vector<128x128xf32>, vector<128x128xf32> -> vector<128x128xf32>
    %43 = vector.broadcast %16 : vector<128x1xf32> to vector<128x128xf32>
    %44 = arith.mulf %42, %43 : vector<128x128xf32>
    %45 = vector.extract_strided_slice %39 {offsets = [0, 128], sizes = [128, 128], strides = [1, 1]} : vector<128x256xf32> to vector<128x128xf32>
    %46 = arith.addf %44, %45 : vector<128x128xf32>
    %c0_21 = arith.constant 0 : index
    %c0_22 = arith.constant 0 : index
    %47 = vector.load %arg6[%c0_21, %c0_22] : memref<8x128xf32, #tpu.memory_space<vmem>>, vector<1x128xf32>
    %48 = vector.broadcast %47 : vector<1x128xf32> to vector<128x128xf32>
    %49 = arith.addf %46, %48 : vector<128x128xf32>
    %c0_23 = arith.constant 0 : index
    %c0_24 = arith.constant 0 : index
    %50 = vector.load %arg7[%c0_23, %c0_24] : memref<128x128xf32, #tpu.memory_space<vmem>>, vector<128x128xf32>
    tpu.vector_store %arg7[%c0_23, %c0_24], %49 {strides = array<i32>} : memref<128x128xf32, #tpu.memory_space<vmem>>, vector<128x128xf32>,
    return
  }
}

</mosaic_0001>

<bundles_post_ra>
// kernel: graphsage_pallas.1
= control target key start
LH: loop header
LB: loop body
LE: loop exit
PB: predicated region body
PF: predicated region fallthrough
CT: control target
= control target key end

     0   :  { %v3201_v3 = vmov 0.0   ;;  %v2015_v4 = vmov 0   ;;  %s3171_s3 = inlined_call_operand.vmem [shape: f32[128,256], index: 3, kind: input, shape index: {}]   ;;  %s3172_s0 = inlined_call_operand.vmem [shape: s32[128,1], index: 0, kind: input, shape index: {}]   ;;  %s3173_s2 = inlined_call_operand.vmem [shape: f32[128,128], index: 2, kind: input, shape index: {}]   ;;  %s3174_s1 = inlined_call_operand.vmem [shape: s32[1,128], index: 1, kind: input, shape index: {}]   ;;  %s3175_s5 = inlined_call_operand.vmem [shape: f32[128,256], index: 5, kind: input, shape index: {}]   ;;  %s3176_s4 = inlined_call_operand.vmem [shape: f32[8,128], index: 4, kind: input, shape index: {}]   ;;  %s3177_s6 = inlined_call_operand.vmem [shape: f32[8,128], index: 6, kind: input, shape index: {}]   ;;  %s3178_s7 = inlined_call_operand.vmem [shape: f32[128,128], index: 7, kind: output, shape index: {}]  }
   0x1   :  { %v321_v0 = vld [vmem:[%s3171_s3 + $0xf8] sm:$0xff]  ;;  %v320_v1 = vld [vmem:[%s3171_s3 + $0xf0] sm:$0xff]  ;;  %v319_v2 = vld [vmem:[%s3171_s3 + $0xe8] sm:$0xff]  ;;  %386 = vmatprep.mubr.f32.mxu0 %v3201_v3  ;;  %1948 = vset.pattern.permute.xlu0 %v2015_v4 }
   0x2   :  { %322 = vmatprep.subr.mxu0 %v321_v0  ;;  %v318_v5 = vld [vmem:[%s3171_s3 + $0xe0] sm:$0xff]  ;;  %1949 = vset.pattern.permute.xlu1 %v2015_v4  ;;  %v317_v6 = vld [vmem:[%s3171_s3 + $0xd8] sm:$0xff]  ;;  %v316_v7 = vld [vmem:[%s3171_s3 + $0xd0] sm:$0xff] }
   0x3   :  { %323 = vmatpush1.msra.mxu0 %v320_v1  ;;  %v315_v8 = vld [vmem:[%s3171_s3 + $0xc8] sm:$0xff]  ;;  %v314_v9 = vld [vmem:[%s3171_s3 + $0xc0] sm:$0xff]  ;;  %v313_v10 = vld [vmem:[%s3171_s3 + $0xb8] sm:$0xff] }
   0x4   :  { %324 = vmatprep.subr.mxu0 %v319_v2  ;;  %v312_v11 = vld [vmem:[%s3171_s3 + $0xb0] sm:$0xff]  ;;  %v311_v12 = vld [vmem:[%s3171_s3 + $0xa8] sm:$0xff]  ;;  %v310_v13 = vld [vmem:[%s3171_s3 + $0xa0] sm:$0xff]  ;;  %v26_v2 = vlaneseq }
   0x5   :  { %325 = vmatpush1.msra.mxu0 %v318_v5  ;;  %v309_v14 = vld [vmem:[%s3171_s3 + $0x98] sm:$0xff]  ;;  %v308_v15 = vld [vmem:[%s3171_s3 + $0x90] sm:$0xff]  ;;  %v307_v16 = vld [vmem:[%s3171_s3 + $0x88] sm:$0xff] }
   0x6   :  { %326 = vmatprep.subr.mxu0 %v317_v6  ;;  %v306_v17 = vld [vmem:[%s3171_s3 + $0x80] sm:$0xff]  ;;  %v305_v18 = vld [vmem:[%s3171_s3 + $0x78] sm:$0xff]  ;;  %v304_v19 = vld [vmem:[%s3171_s3 + $0x70] sm:$0xff]  ;;  %v2267_v4 = vand.u32 127, %v26_v2  ;;  %v3195_v6 = vmov 1.0  }
   0x7   :  { %327 = vmatpush1.msra.mxu0 %v316_v7  ;;  %v303_v20 = vld [vmem:[%s3171_s3 + $0x68] sm:$0xff]  ;;  %v28_v21 = vld [vmem:[%s3172_s0] sm:$0xff]  ;;  %v30_v22 = vld [vmem:[%s3172_s0 + $0x10] sm:$0xff] }
   0x8   :  { %328 = vmatprep.subr.mxu0 %v315_v8  ;;  %v302_v23 = vld [vmem:[%s3171_s3 + $0x60] sm:$0xff]  ;;  %45 = vperm.xlu0 %1948, %v28_v21   ;;  %v301_v24 = vld [vmem:[%s3171_s3 + $0x58] sm:$0xff]  ;;  %v29_v25 = vld [vmem:[%s3172_s0 + $0x8] sm:$0xff] }
   0x9   :  { %329 = vmatpush1.msra.mxu0 %v314_v9  ;;  %51 = vperm.xlu1 %1949, %v30_v22   ;;  %v300_v26 = vld [vmem:[%s3171_s3 + $0x50] sm:$0xff]  ;;  %v31_v27 = vld [vmem:[%s3172_s0 + $0x18] sm:$0xff]  ;;  %v299_v28 = vld [vmem:[%s3171_s3 + $0x48] sm:$0xff] }
   0xa   :  { %330 = vmatprep.subr.mxu0 %v313_v10  ;;  %v298_v29 = vld [vmem:[%s3171_s3 + $0x40] sm:$0xff]  ;;  %v297_v30 = vld [vmem:[%s3171_s3 + $0x38] sm:$0xff]  ;;  %v296_v32 = vld [vmem:[%s3171_s3 + $0x30] sm:$0xff] }
   0xb   :  { %331 = vmatpush1.msra.mxu0 %v312_v11  ;;  %v32_v31 = vld [vmem:[%s3172_s0 + $0x20] sm:$0xff]  ;;  %v33_v33 = vld [vmem:[%s3172_s0 + $0x28] sm:$0xff]  ;;  %v293_v36 = vld [vmem:[%s3171_s3 + $0x18] sm:$0xff] }
   0xc   :  { %332 = vmatprep.subr.mxu0 %v311_v12  ;;  %48 = vperm.xlu0 %1948, %v29_v25   ;;  %v295_v34 = vld [vmem:[%s3171_s3 + $0x28] sm:$0xff]  ;;  %v294_v35 = vld [vmem:[%s3171_s3 + $0x20] sm:$0xff]  ;;  %v34_v37 = vld [vmem:[%s3172_s0 + $0x30] sm:$0xff] }
   0xd   :  { %333 = vmatpush1.msra.mxu0 %v310_v13  ;;  %54 = vperm.xlu1 %1949, %v31_v27   ;;  %v292_v38 = vld [vmem:[%s3171_s3 + $0x10] sm:$0xff]  ;;  %v35_v39 = vld [vmem:[%s3172_s0 + $0x38] sm:$0xff]  ;;  %v291_v40 = vld [vmem:[%s3171_s3 + $0x8] sm:$0xff] }
   0xe   :  { %334 = vmatprep.subr.mxu0 %v309_v14  ;;  %v290_v41 = vld [vmem:[%s3171_s3] sm:$0xff]  ;;  %v37_v44 = vld [vmem:[%s3172_s0 + $0x48] sm:$0xff]  ;;  %v38_v46 = vld [vmem:[%s3172_s0 + $0x50] sm:$0xff] }
   0xf   :  { %335 = vmatpush1.msra.mxu0 %v308_v15  ;;  %v274_v42 = vld [vmem:[%s3173_s2] sm:$0xff]  ;;  %v275_v45 = vld [vmem:[%s3173_s2 + $0x8] sm:$0xff]  ;;  %v39_v47 = vld [vmem:[%s3172_s0 + $0x58] sm:$0xff] }
  0x10   :  { %336 = vmatprep.subr.mxu0 %v307_v16  ;;  %57 = vperm.xlu0 %1948, %v32_v31   ;;  %v36_v43 = vld [vmem:[%s3172_s0 + $0x40] sm:$0xff]  ;;  %v276_v48 = vld [vmem:[%s3173_s2 + $0x10] sm:$0xff]  ;;  %v41_v50 = vld [vmem:[%s3172_s0 + $0x68] sm:$0xff] }
  0x11   :  { %337 = vmatpush1.msra.mxu0 %v306_v17  ;;  %60 = vperm.xlu1 %1949, %v33_v33   ;;  %v40_v49 = vld [vmem:[%s3172_s0 + $0x60] sm:$0xff]  ;;  %v277_v51 = vld [vmem:[%s3173_s2 + $0x18] sm:$0xff]  ;;  %v42_v52 = vld [vmem:[%s3172_s0 + $0x70] sm:$0xff] }
  0x12   :  { %338 = vmatprep.subr.mxu0 %v305_v18  ;;  %v43_v53 = vld [vmem:[%s3172_s0 + $0x78] sm:$0xff]  ;;  %v278_v54 = vld [vmem:[%s3173_s2 + $0x20] sm:$0xff]  ;;  %v279_v55 = vld [vmem:[%s3173_s2 + $0x28] sm:$0xff] }
  0x13   :  { %339 = vmatpush1.msra.mxu0 %v304_v19  ;;  %v280_v56 = vld [vmem:[%s3173_s2 + $0x30] sm:$0xff]  ;;  %v281_v57 = vld [vmem:[%s3173_s2 + $0x38] sm:$0xff]  ;;  %v282_v58 = vld [vmem:[%s3173_s2 + $0x40] sm:$0xff] }
  0x14   :  { %340 = vmatprep.subr.mxu0 %v303_v20  ;;  %63 = vperm.xlu0 %1948, %v34_v37   ;;  %v283_v59 = vld [vmem:[%s3173_s2 + $0x48] sm:$0xff]  ;;  %v284_v60 = vld [vmem:[%s3173_s2 + $0x50] sm:$0xff]  ;;  %v285_v61 = vld [vmem:[%s3173_s2 + $0x58] sm:$0xff] }
  0x15   :  { %341 = vmatpush1.msra.mxu0 %v302_v23  ;;  %66 = vperm.xlu1 %1949, %v35_v39   ;;  %v286_v62 = vld [vmem:[%s3173_s2 + $0x60] sm:$0xff]  ;;  %v287_v63 = vld [vmem:[%s3173_s2 + $0x68] sm:$0xff]  ;;  %v288_v0 = vld [vmem:[%s3173_s2 + $0x70] sm:$0xff] }
  0x16   :  { %342 = vmatprep.subr.mxu0 %v301_v24  ;;  %v289_v1 = vld [vmem:[%s3173_s2 + $0x78] sm:$0xff] }
  0x17   :  { %343 = vmatpush1.msra.mxu0 %v300_v26 }
  0x18   :  { %344 = vmatprep.subr.mxu0 %v299_v28  ;;  %69 = vperm.xlu0 %1948, %v36_v43  }
  0x19   :  { %345 = vmatpush1.msra.mxu0 %v298_v29  ;;  %72 = vperm.xlu1 %1949, %v37_v44  }
  0x1a   :  { %346 = vmatprep.subr.mxu0 %v297_v30 }
  0x1b   :  { %347 = vmatpush1.msra.mxu0 %v296_v32 }
  0x1c   :  { %348 = vmatprep.subr.mxu0 %v295_v34  ;;  %75 = vperm.xlu0 %1948, %v38_v46  }
  0x1d   :  { %349 = vmatpush1.msra.mxu0 %v294_v35  ;;  %78 = vperm.xlu1 %1949, %v39_v47  }
  0x1e   :  { %350 = vmatprep.subr.mxu0 %v293_v36 }
  0x1f   :  { %351 = vmatpush1.msra.mxu0 %v292_v38 }
  0x20   :  { %352 = vmatprep.subr.mxu0 %v291_v40  ;;  %81 = vperm.xlu0 %1948, %v40_v49  }
  0x21   :  { %353 = vmatpush1.msra.mxu0 %v290_v41  ;;  %84 = vperm.xlu1 %1949, %v41_v50  }
  0x22   :  { %387 = vmatmul.mubr.f32.vlgmr.msra.gmra.mxu0 %v274_v42 }
  0x23   :  { %392 = vmatprep.mubr.f32.mxu0 %v3201_v3 }
  0x24   :  { %87 = vperm.xlu0 %1948, %v42_v52  }
  0x25   :  { %90 = vperm.xlu1 %1949, %v43_v53   ;;  %v2436_v53 = vshrl.u32 %v26_v2, 7  ;;  %v951_v2 = vld [vmem:[%s3175_s5 + $0xe8] sm:$0xff] }
  0x26   :  { %393 = vmatmul.mubr.f32.gmra.mxu0 %v275_v45 }
  0x27   :  { %398 = vmatprep.mubr.f32.mxu0 %v3201_v3  ;;  %3223 = vst [vmem:[#allocation5_spill] sm:$0xff] %v2436_v53 }
  0x2a   :  { %399 = vmatmul.mubr.f32.gmra.mxu0 %v276_v48 }
  0x2b   :  { %404 = vmatprep.mubr.f32.mxu0 %v3201_v3 }
  0x2e   :  { %405 = vmatmul.mubr.f32.gmra.mxu0 %v277_v51 }
  0x2f   :  { %410 = vmatprep.mubr.f32.mxu0 %v3201_v3 }
  0x32   :  { %411 = vmatmul.mubr.f32.gmra.mxu0 %v278_v54  ;;  %v2441_v54 = vld [vmem:[%s3174_s1] ss:$0 sm:$0xff] }
  0x33   :  { %416 = vmatprep.mubr.f32.mxu0 %v3201_v3 }
  0x36   :  { %417 = vmatmul.mubr.f32.gmra.mxu0 %v279_v55  ;;  %v2450_v55 = vadd.s32 8, %v2436_v53 }
  0x37   :  { %422 = vmatprep.mubr.f32.mxu0 %v3201_v3 }
  0x3a   :  { %423 = vmatmul.mubr.f32.gmra.mxu0 %v280_v56  ;;  %v2453_v56 = vadd.s32 16, %v2436_v53 }
  0x3b   :  { %428 = vmatprep.mubr.f32.mxu0 %v3201_v3 }
  0x3e   :  { %429 = vmatmul.mubr.f32.gmra.mxu0 %v281_v57  ;;  %v2456_v57 = vadd.s32 32, %v2436_v53 }
  0x3f   :  { %434 = vmatprep.mubr.f32.mxu0 %v3201_v3 }
  0x42   :  { %435 = vmatmul.mubr.f32.gmra.mxu0 %v282_v58 }
  0x43   :  { %440 = vmatprep.mubr.f32.mxu0 %v3201_v3 }
  0x46   :  { %441 = vmatmul.mubr.f32.gmra.mxu0 %v283_v59 }
  0x47   :  { %446 = vmatprep.mubr.f32.mxu0 %v3201_v3 }
  0x4a   :  { %447 = vmatmul.mubr.f32.gmra.mxu0 %v284_v60  ;;  %v2471_v60 = vadd.s32 24, %v2436_v53 }
  0x4b   :  { %452 = vmatprep.mubr.f32.mxu0 %v3201_v3 }
  0x4e   :  { %453 = vmatmul.mubr.f32.gmra.mxu0 %v285_v61  ;;  %v2476_v61 = vadd.s32 48, %v2436_v53 }
  0x4f   :  { %458 = vmatprep.mubr.f32.mxu0 %v3201_v3 }
  0x52   :  { %459 = vmatmul.mubr.f32.gmra.mxu0 %v286_v62  ;;  %v953_v62 = vld [vmem:[%s3175_s5 + $0xf8] sm:$0xff] }
  0x53   :  { %464 = vmatprep.mubr.f32.mxu0 %v3201_v3  ;;  %954 = vmatprep.subr.mxu0 %v953_v62 }
  0x56   :  { %465 = vmatmul.mubr.f32.gmra.mxu0 %v287_v63  ;;  %v952_v63 = vld [vmem:[%s3175_s5 + $0xf0] sm:$0xff] }
  0x57   :  { %470 = vmatprep.mubr.f32.mxu0 %v3201_v3  ;;  %955 = vmatpush1.msra.mxu0 %v952_v63  ;;  %v2573_v63 = vadd.s32 88, %v2436_v53 }
  0x58   :  { %956 = vmatprep.subr.mxu0 %v951_v2  ;;  %v942_v2 = vld [vmem:[%s3175_s5 + $0xa0] sm:$0xff] }
  0x5a   :  { %471 = vmatmul.mubr.f32.gmra.mxu0 %v288_v0 }
  0x5b   :  { %476 = vmatprep.mubr.f32.mxu0 %v3201_v3 }
  0x5e   :  { %477 = vmatmul.mubr.f32.gmra.mxu0 %v289_v1 }
  0x5f   :  { %1018 = vmatprep.mubr.f32.mxu0 %v3201_v3 }
  0x83   :  { %v2269_v5 = vpop.permute.xlu0 %45 }
  0x84   :  { %vm92_vm0 = vcmp.eq.s32.totalorder %v2267_v4, %v2269_v5  ;;  %v2311_v38 = vpop.permute.xlu1 %51  ;;  %v932_v5 = vld [vmem:[%s3175_s5 + $0x50] sm:$0xff] }
  0x85   :  { %1753 = vmatprep.mubr.msk.f32.mxu1 %vm92_vm0, %v3195_v6  ;;  %vm3193_vm1 = vcmp.eq.s32.totalorder %v2267_v4, %v2311_v38 }
  0x87   :  { %v2313_v39 = vpop.permute.xlu0 %48 }
  0x88   :  { %v2315_v40 = vpop.permute.xlu1 %54  ;;  %vm3194_vm2 = vcmp.eq.s32.totalorder %v2267_v4, %v2313_v39 }
  0x89   :  { %vm3192_vm3 = vcmp.eq.s32.totalorder %v2267_v4, %v2315_v40 }
  0x8b   :  { %v2317_v41 = vpop.permute.xlu0 %57 }
  0x8c   :  { %v2319_v42 = vpop.permute.xlu1 %60  ;;  %vm3191_vm4 = vcmp.eq.s32.totalorder %v2267_v4, %v2317_v41 }
  0x8d   :  { %vm3190_vm5 = vcmp.eq.s32.totalorder %v2267_v4, %v2319_v42 }
  0x8f   :  { %v2322_v43 = vpop.permute.xlu0 %63 }
  0x90   :  { %v2331_v44 = vpop.permute.xlu1 %66  ;;  %vm3189_vm6 = vcmp.eq.s32.totalorder %v2267_v4, %v2322_v43 }
  0x91   :  { %vm3188_vm7 = vcmp.eq.s32.totalorder %v2267_v4, %v2331_v44 }
  0x93   :  { %v2343_v45 = vpop.permute.xlu0 %69 }
  0x94   :  { %v2355_v46 = vpop.permute.xlu1 %72  ;;  %vm3187_vm8 = vcmp.eq.s32.totalorder %v2267_v4, %v2343_v45 }
  0x95   :  { %vm3186_vm9 = vcmp.eq.s32.totalorder %v2267_v4, %v2355_v46 }
  0x97   :  { %v2365_v47 = vpop.permute.xlu0 %75 }
  0x98   :  { %v2375_v48 = vpop.permute.xlu1 %78  ;;  %vm3185_vm10 = vcmp.eq.s32.totalorder %v2267_v4, %v2365_v47 }
  0x99   :  { %vm3184_vm11 = vcmp.eq.s32.totalorder %v2267_v4, %v2375_v48 }
  0x9b   :  { %v2387_v49 = vpop.permute.xlu0 %81 }
  0x9c   :  { %v2399_v50 = vpop.permute.xlu1 %84  ;;  %vm3182_vm12 = vcmp.eq.s32.totalorder %v2267_v4, %v2387_v49 }
  0x9d   :  { %3220 = vst [vmem:[#allocation2_spill] sm:$0xff] %v2399_v50  ;;  %vm3179_vm13 = vcmp.eq.s32.totalorder %v2267_v4, %v2399_v50 }
  0x9f   :  { %v2409_v51 = vpop.permute.xlu0 %87 }
  0xa0   :  { %3221 = vst [vmem:[#allocation3_spill] sm:$0xff] %v2409_v51  ;;  %vm3181_vm14 = vcmp.eq.s32.totalorder %v2267_v4, %v2409_v51  ;;  %v2419_v52 = vpop.permute.xlu1 %90 }
  0xa1   :  { %3222 = vst [vmem:[#allocation4_spill] sm:$0xff] %v2419_v52  ;;  %vm3180_vm15 = vcmp.eq.s32.totalorder %v2267_v4, %v2419_v52 }
  0xe2   :  { %v2277_v7 = vpop.f32.mrf.mxu0 }
  0xe4   :  { %v2279_v8 = vpop.f32.mrf.mxu0 }
  0xe6   :  { %v2281_v9 = vpop.f32.mrf.mxu0 }
  0xe8   :  { %v2283_v10 = vpop.f32.mrf.mxu0 }
  0xea   :  { %v400_v11 = vpop.f32.mrf.mxu0 }
  0xec   :  { %v2285_v12 = vpop.f32.mrf.mxu0 }
  0xee   :  { %v406_v13 = vpop.f32.mrf.mxu0 }
  0xf0   :  { %v2287_v14 = vpop.f32.mrf.mxu0 }
  0xf2   :  { %v412_v15 = vpop.f32.mrf.mxu0 }
  0xf4   :  { %v2289_v16 = vpop.f32.mrf.mxu0 }
  0xf6   :  { %v418_v17 = vpop.f32.mrf.mxu0 }
  0xf8   :  { %v2291_v18 = vpop.f32.mrf.mxu0 }
  0xfa   :  { %v424_v19 = vpop.f32.mrf.mxu0 }
  0xfc   :  { %v2293_v20 = vpop.f32.mrf.mxu0 }
  0xfe   :  { %v430_v21 = vpop.f32.mrf.mxu0 }
 0x100   :  { %v2295_v22 = vpop.f32.mrf.mxu0 }
 0x102   :  { %v436_v23 = vpop.f32.mrf.mxu0 }
 0x104   :  { %v2297_v24 = vpop.f32.mrf.mxu0 }
 0x106   :  { %v442_v25 = vpop.f32.mrf.mxu0 }
 0x108   :  { %v2299_v26 = vpop.f32.mrf.mxu0 }
 0x10a   :  { %v448_v27 = vpop.f32.mrf.mxu0 }
 0x10c   :  { %v2301_v28 = vpop.f32.mrf.mxu0 }
 0x10e   :  { %v454_v29 = vpop.f32.mrf.mxu0 }
 0x110   :  { %v2303_v30 = vpop.f32.mrf.mxu0 }
 0x112   :  { %v460_v31 = vpop.f32.mrf.mxu0 }
 0x114   :  { %v2305_v32 = vpop.f32.mrf.mxu0 }
 0x116   :  { %v466_v33 = vpop.f32.mrf.mxu0 }
 0x118   :  { %v2307_v34 = vpop.f32.mrf.mxu0 }
 0x11a   :  { %v472_v35 = vpop.f32.mrf.mxu0 }
 0x11c   :  { %v2309_v36 = vpop.f32.mrf.mxu0 }
 0x11e   :  { %v478_v37 = vpop.f32.mrf.mxu0 }
 0x11f   :  { %1721 = vmatprep.subr.mxu1 %v478_v37 }
 0x120   :  { %1722 = vmatpush3.msra.mxu1 %v478_v37  ;;  %v945_v37 = vld [vmem:[%s3175_s5 + $0xb8] sm:$0xff] }
 0x121   :  { %1723 = vmatprep.subr.mxu1 %v472_v35 }
 0x122   :  { %1724 = vmatpush3.msra.mxu1 %v472_v35  ;;  %v2554_v35 = vadd.s32 96, %v2436_v53 }
 0x123   :  { %1725 = vmatprep.subr.mxu1 %v466_v33 }
 0x124   :  { %1726 = vmatpush3.msra.mxu1 %v466_v33  ;;  %v2549_v33 = vadd.s32 72, %v2436_v53 }
 0x125   :  { %1727 = vmatprep.subr.mxu1 %v460_v31 }
 0x126   :  { %1728 = vmatpush3.msra.mxu1 %v460_v31 }
 0x127   :  { %1729 = vmatprep.subr.mxu1 %v454_v29 }
 0x128   :  { %1730 = vmatpush3.msra.mxu1 %v454_v29 }
 0x129   :  { %1731 = vmatprep.subr.mxu1 %v448_v27 }
 0x12a   :  { %1732 = vmatpush3.msra.mxu1 %v448_v27  ;;  %v2536_v27 = vadd.s32 80, %v2436_v53 }
 0x12b   :  { %1733 = vmatprep.subr.mxu1 %v442_v25 }
 0x12c   :  { %1734 = vmatpush3.msra.mxu1 %v442_v25  ;;  %v2531_v25 = vadd.s32 56, %v2436_v53 }
 0x12d   :  { %1735 = vmatprep.subr.mxu1 %v436_v23 }
 0x12e   :  { %1736 = vmatpush3.msra.mxu1 %v436_v23  ;;  %v946_v23 = vld [vmem:[%s3175_s5 + $0xc0] sm:$0xff] }
 0x12f   :  { %1737 = vmatprep.subr.mxu1 %v430_v21 }
 0x130   :  { %1738 = vmatpush3.msra.mxu1 %v430_v21  ;;  %v947_v21 = vld [vmem:[%s3175_s5 + $0xc8] sm:$0xff] }
 0x131   :  { %1739 = vmatprep.subr.mxu1 %v424_v19 }
 0x132   :  { %1740 = vmatpush3.msra.mxu1 %v424_v19 }
 0x133   :  { %1741 = vmatprep.subr.mxu1 %v418_v17 }
 0x134   :  { %1742 = vmatpush3.msra.mxu1 %v418_v17 }
 0x135   :  { %1743 = vmatprep.subr.mxu1 %v412_v15 }
 0x136   :  { %1744 = vmatpush3.msra.mxu1 %v412_v15  ;;  %v948_v15 = vld [vmem:[%s3175_s5 + $0xd0] sm:$0xff] }
 0x137   :  { %1745 = vmatprep.subr.mxu1 %v406_v13 }
 0x138   :  { %1746 = vmatpush3.msra.mxu1 %v406_v13  ;;  %v2509_v13 = vadd.s32 64, %v2436_v53 }
 0x139   :  { %1747 = vmatprep.subr.mxu1 %v400_v11 }
 0x13a   :  { %1748 = vmatpush3.msra.mxu1 %v400_v11  ;;  %v2504_v11 = vadd.s32 40, %v2436_v53 }
 0x13b   :  { %1749 = vmatprep.subr.mxu1 %v2281_v9 }
 0x13c   :  { %1750 = vmatpush3.msra.mxu1 %v2281_v9  ;;  %v949_v9 = vld [vmem:[%s3175_s5 + $0xd8] sm:$0xff] }
 0x13d   :  { %1751 = vmatprep.subr.mxu1 %v2277_v7 }
 0x13e   :  { %1752 = vmatpush3.msra.mxu1 %v2277_v7  ;;  %v950_v7 = vld [vmem:[%s3175_s5 + $0xe0] sm:$0xff] }
 0x13f   :  { %1754 = vmatmul.mubr.msk.f32.vlgmr.msra.gmra.mxu1 %vm3194_vm2, %v3195_v6  ;;  %957 = vmatpush1.msra.mxu0 %v950_v7 }
 0x140   :  { %1756 = vmatprep.mubr.msk.f32.mxu1 %vm3193_vm1, %v3195_v6  ;;  %958 = vmatprep.subr.mxu0 %v949_v9 }
 0x141   :  { %959 = vmatpush1.msra.mxu0 %v948_v15  ;;  %v2597_v15 = vadd.s32 104, %v2436_v53 }
 0x142   :  { %960 = vmatprep.subr.mxu0 %v947_v21 }
 0x143   :  { %1757 = vmatmul.mubr.msk.f32.gmra.mxu1 %vm3192_vm3, %v3195_v6  ;;  %961 = vmatpush1.msra.mxu0 %v946_v23  ;;  %vm3218_vm1 = vcmp.eq.s32.totalorder %v2597_v15, %v2441_v54 }
 0x144   :  { %1759 = vmatprep.mubr.msk.f32.mxu1 %vm3191_vm4, %v3195_v6  ;;  %962 = vmatprep.subr.mxu0 %v945_v37  ;;  %vm173_vm4 = vcmp.eq.s32.totalorder %v2573_v63, %v2441_v54  ;;  %v938_v37 = vld [vmem:[%s3175_s5 + $0x80] sm:$0xff] }
 0x145   :  { %v1506_v21 = vsel %vm173_vm4, 1.0, %v3201_v3 }
 0x147   :  { %1760 = vmatmul.mubr.msk.f32.gmra.mxu1 %vm3190_vm5, %v3195_v6  ;;  %vm3219_vm5 = vcmp.eq.s32.totalorder %v2554_v35, %v2441_v54 }
 0x148   :  { %1762 = vmatprep.mubr.msk.f32.mxu1 %vm3189_vm6, %v3195_v6  ;;  %vm171_vm6 = vcmp.eq.s32.totalorder %v2549_v33, %v2441_v54  ;;  %v1507_v9 = vsel %vm3219_vm5, 1.0, %v3201_v3 }
 0x149   :  { %v1504_v7 = vsel %vm171_vm6, 1.0, %v3201_v3 }
 0x14b   :  { %1763 = vmatmul.mubr.msk.f32.gmra.mxu1 %vm3188_vm7, %v3195_v6  ;;  %vm172_vm7 = vcmp.eq.s32.totalorder %v2536_v27, %v2441_v54 }
 0x14c   :  { %1765 = vmatprep.mubr.msk.f32.mxu1 %vm3187_vm8, %v3195_v6  ;;  %vm169_vm8 = vcmp.eq.s32.totalorder %v2531_v25, %v2441_v54  ;;  %v1505_v62 = vsel %vm172_vm7, 1.0, %v3201_v3 }
 0x14f   :  { %1766 = vmatmul.mubr.msk.f32.gmra.mxu1 %vm3186_vm9, %v3195_v6  ;;  %vm170_vm9 = vcmp.eq.s32.totalorder %v2509_v13, %v2441_v54 }
 0x150   :  { %1768 = vmatprep.mubr.msk.f32.mxu1 %vm3185_vm10, %v3195_v6  ;;  %vm167_vm10 = vcmp.eq.s32.totalorder %v2504_v11, %v2441_v54  ;;  %v1503_v31 = vsel %vm170_vm9, 1.0, %v3201_v3  ;;  %v3075_v11 = vld [vmem:[%s3177_s6] ss:$0 sm:$0xff] }
 0x151   :  { %v1500_v29 = vsel %vm167_vm10, 1.0, %v3201_v3 }
 0x153   :  { %1769 = vmatmul.mubr.msk.f32.gmra.mxu1 %vm3184_vm11, %v3195_v6  ;;  %vm168_vm11 = vcmp.eq.s32.totalorder %v2476_v61, %v2441_v54 }
 0x154   :  { %1771 = vmatprep.mubr.msk.f32.mxu1 %vm3182_vm12, %v3195_v6  ;;  %vm166_vm12 = vcmp.eq.s32.totalorder %v2456_v57, %v2441_v54  ;;  %v1501_v19 = vsel %vm168_vm11, 1.0, %v3201_v3 }
 0x155   :  { %v1499_v1 = vsel %vm166_vm12, 1.0, %v3201_v3 }
 0x157   :  { %1772 = vmatmul.mubr.msk.f32.gmra.mxu1 %vm3179_vm13, %v3195_v6  ;;  %vm3183_vm13 = vcmp.eq.s32.totalorder %v2436_v53, %v2441_v54 }
 0x158   :  { %1774 = vmatprep.mubr.msk.f32.mxu1 %vm3181_vm14, %v3195_v6  ;;  %v1495_v58 = vsel %vm3183_vm13, 1.0, %v3201_v3  ;;  %vm164_vm14 = vcmp.eq.s32.totalorder %v2453_v56, %v2441_v54 }
 0x159   :  { %210 = vadd.xlane.f32.xlu0 %v1495_v58  ;;  %v1497_v0 = vsel %vm164_vm14, 1.0, %v3201_v3  ;;  %v944_v58 = vld [vmem:[%s3175_s5 + $0xb0] sm:$0xff] }
 0x15a   :  { %963 = vmatpush1.msra.mxu0 %v944_v58  ;;  %v1508_v58 = vsel %vm3218_vm1, 1.0, %v3201_v3 }
 0x15b   :  { %1775 = vmatmul.mubr.msk.f32.gmra.mxu1 %vm3180_vm15, %v3195_v6  ;;  %vm163_vm15 = vcmp.eq.s32.totalorder %v2450_v55, %v2441_v54 }
 0x15c   :  { %1809 = vmatprep.mubr.msk.f32.mxu1 %vm3183_vm13, %v3195_v6  ;;  %v1496_v59 = vsel %vm163_vm15, 1.0, %v3201_v3  ;;  %vm165_vm13 = vcmp.eq.s32.totalorder %v2471_v60, %v2441_v54 }
 0x15d   :  { %212 = vadd.xlane.f32.xlu1 %v1496_v59  ;;  %214 = vadd.xlane.f32.xlu0 %v1497_v0  ;;  %v1498_v17 = vsel %vm165_vm13, 1.0, %v3201_v3  ;;  %v1502_v59 = vsel %vm169_vm8, 1.0, %v3201_v3  ;;  %v2578_v0 = vadd.s32 112, %v2436_v53 }
 0x15f   :  { %3224 = vst [vmem:[#allocation6_spill] sm:$0xff] %v2578_v0  ;;  %vm3216_vm3 = vcmp.eq.s32.totalorder %v2578_v0, %v2441_v54 }
 0x160   :  { %v1509_v23 = vsel %vm3216_vm3, 1.0, %v3201_v3 }
 0x161   :  { %218 = vadd.xlane.f32.xlu1 %v1499_v1  ;;  %216 = vadd.xlane.f32.xlu0 %v1498_v17  ;;  %v943_v1 = vld [vmem:[%s3175_s5 + $0xa8] sm:$0xff]  ;;  %v941_v17 = vld [vmem:[%s3175_s5 + $0x98] sm:$0xff] }
 0x162   :  { %964 = vmatprep.subr.mxu0 %v943_v1 }
 0x163   :  { %965 = vmatpush1.msra.mxu0 %v942_v2 }
 0x164   :  { %966 = vmatprep.subr.mxu0 %v941_v17 }
 0x165   :  { %222 = vadd.xlane.f32.xlu1 %v1501_v19  ;;  %220 = vadd.xlane.f32.xlu0 %v1500_v29  ;;  %v940_v19 = vld [vmem:[%s3175_s5 + $0x90] sm:$0xff]  ;;  %v2618_v29 = vadd.s32 120, %v2436_v53 }
 0x166   :  { %967 = vmatpush1.msra.mxu0 %v940_v19  ;;  %v3261_v55 = vld [vmem:[#allocation6_spill] sm:$0xff] }
 0x167   :  { %3225 = vst [vmem:[#allocation7_spill] sm:$0xff] %v2618_v29  ;;  %vm3215_vm2 = vcmp.eq.s32.totalorder %v2618_v29, %v2441_v54 }
 0x168   :  { %v1510_v1 = vsel %vm3215_vm2, 1.0, %v3201_v3 }
 0x169   :  { %226 = vadd.xlane.f32.xlu1 %v1503_v31  ;;  %224 = vadd.xlane.f32.xlu0 %v1502_v59  ;;  %v939_v31 = vld [vmem:[%s3175_s5 + $0x88] sm:$0xff]  ;;  %v937_v59 = vld [vmem:[%s3175_s5 + $0x78] sm:$0xff] }
 0x16a   :  { %968 = vmatprep.subr.mxu0 %v939_v31 }
 0x16b   :  { %969 = vmatpush1.msra.mxu0 %v938_v37 }
 0x16c   :  { %970 = vmatprep.subr.mxu0 %v937_v59  ;;  %v929_v59 = vld [vmem:[%s3175_s5 + $0x38] sm:$0xff] }
 0x16d   :  { %230 = vadd.xlane.f32.xlu1 %v1505_v62  ;;  %228 = vadd.xlane.f32.xlu0 %v1504_v7  ;;  %v936_v62 = vld [vmem:[%s3175_s5 + $0x70] sm:$0xff] }
 0x16e   :  { %971 = vmatpush1.msra.mxu0 %v936_v62  ;;  %v928_v62 = vld [vmem:[%s3175_s5 + $0x30] sm:$0xff]  ;;  %v3263_v56 = vld [vmem:[#allocation7_spill] sm:$0xff] }
 0x171   :  { %234 = vadd.xlane.f32.xlu1 %v1507_v9  ;;  %232 = vadd.xlane.f32.xlu0 %v1506_v21 }
 0x175   :  { %238 = vadd.xlane.f32.xlu1 %v1509_v23  ;;  %236 = vadd.xlane.f32.xlu0 %v1508_v58 }
 0x179   :  { %240 = vadd.xlane.f32.xlu0 %v1510_v1  ;;  %v927_v1 = vld [vmem:[%s3175_s5 + $0x28] sm:$0xff] }
 0x1ff   :  { %v1755_v2 = vpop.f32.mrf.mxu1 }
 0x201   :  { %v549_v7 = vpop.f32.mrf.mxu1 }
 0x203   :  { %v1758_v9 = vpop.f32.mrf.mxu1 }
 0x205   :  { %v559_v17 = vpop.f32.mrf.mxu1 }
 0x207   :  { %v1761_v19 = vpop.f32.mrf.mxu1 }
 0x209   :  { %v569_v21 = vpop.f32.mrf.mxu1 }
 0x20b   :  { %v1764_v23 = vpop.f32.mrf.mxu1 }
 0x20d   :  { %v579_v31 = vpop.f32.mrf.mxu1 }
 0x20f   :  { %v1767_v37 = vpop.f32.mrf.mxu1 }
 0x211   :  { %v589_v58 = vpop.f32.mrf.mxu1 }
 0x213   :  { %v1770_v6 = vpop.f32.mrf.mxu1 }
 0x215   :  { %v599_v53 = vpop.f32.mrf.mxu1 }
 0x217   :  { %v1773_v52 = vpop.f32.mrf.mxu1 }
 0x219   :  { %v609_v51 = vpop.f32.mrf.mxu1 }
 0x21b   :  { %v1776_v50 = vpop.f32.mrf.mxu1 }
 0x21c   :  { %1777 = vmatprep.subr.mxu1 %v1776_v50 }
 0x21d   :  { %v619_v3 = vpop.f32.mrf.mxu1  ;;  %1778 = vmatpush3.msra.mxu1 %v1776_v50  ;;  %v934_v50 = vld [vmem:[%s3175_s5 + $0x60] sm:$0xff] }
 0x21e   :  { %1779 = vmatprep.subr.mxu1 %v619_v3 }
 0x21f   :  { %1780 = vmatpush3.msra.mxu1 %v619_v3  ;;  %v3226_v3 = vmov 1.0  }
 0x220   :  { %1781 = vmatprep.subr.mxu1 %v1773_v52 }
 0x221   :  { %1782 = vmatpush3.msra.mxu1 %v1773_v52  ;;  %v931_v52 = vld [vmem:[%s3175_s5 + $0x48] sm:$0xff] }
 0x222   :  { %1783 = vmatprep.subr.mxu1 %v609_v51 }
 0x223   :  { %1784 = vmatpush3.msra.mxu1 %v609_v51  ;;  %v933_v51 = vld [vmem:[%s3175_s5 + $0x58] sm:$0xff] }
 0x224   :  { %1785 = vmatprep.subr.mxu1 %v1770_v6 }
 0x225   :  { %1786 = vmatpush3.msra.mxu1 %v1770_v6  ;;  %v935_v6 = vld [vmem:[%s3175_s5 + $0x68] sm:$0xff] }
 0x226   :  { %1787 = vmatprep.subr.mxu1 %v599_v53  ;;  %972 = vmatprep.subr.mxu0 %v935_v6 }
 0x227   :  { %1788 = vmatpush3.msra.mxu1 %v599_v53  ;;  %973 = vmatpush1.msra.mxu0 %v934_v50  ;;  %v930_v53 = vld [vmem:[%s3175_s5 + $0x40] sm:$0xff] }
 0x228   :  { %1789 = vmatprep.subr.mxu1 %v1767_v37  ;;  %974 = vmatprep.subr.mxu0 %v933_v51 }
 0x229   :  { %1790 = vmatpush3.msra.mxu1 %v1767_v37  ;;  %975 = vmatpush1.msra.mxu0 %v932_v5 }
 0x22a   :  { %1791 = vmatprep.subr.mxu1 %v589_v58  ;;  %976 = vmatprep.subr.mxu0 %v931_v52 }
 0x22b   :  { %1792 = vmatpush3.msra.mxu1 %v589_v58  ;;  %977 = vmatpush1.msra.mxu0 %v930_v53 }
 0x22c   :  { %1793 = vmatprep.subr.mxu1 %v1764_v23  ;;  %978 = vmatprep.subr.mxu0 %v929_v59 }
 0x22d   :  { %1794 = vmatpush3.msra.mxu1 %v1764_v23  ;;  %979 = vmatpush1.msra.mxu0 %v928_v62 }
 0x22e   :  { %1795 = vmatprep.subr.mxu1 %v579_v31  ;;  %980 = vmatprep.subr.mxu0 %v927_v1 }
 0x22f   :  { %1796 = vmatpush3.msra.mxu1 %v579_v31  ;;  %v213_v31 = vpop.xlane.xlu1 %212 }
 0x230   :  { %1797 = vmatprep.subr.mxu1 %v1761_v19  ;;  %v243_v37 = vmax.f32 %v213_v31, 1.0 }
 0x231   :  { %1798 = vmatpush3.msra.mxu1 %v1761_v19  ;;  %v922_v19 = vld [vmem:[%s3175_s5] sm:$0xff] }
 0x232   :  { %1799 = vmatprep.subr.mxu1 %v569_v21  ;;  %1950 = vrcp.f32 %v243_v37 }
 0x233   :  { %1800 = vmatpush3.msra.mxu1 %v569_v21  ;;  %v211_v21 = vpop.xlane.xlu0 %210  ;;  %v219_v51 = vpop.xlane.xlu1 %218 }
 0x234   :  { %1801 = vmatprep.subr.mxu1 %v1758_v9  ;;  %v242_v6 = vmax.f32 %v211_v21, 1.0  ;;  %v246_v59 = vmax.f32 %v219_v51, 1.0 }
 0x235   :  { %1802 = vmatpush3.msra.mxu1 %v1758_v9  ;;  %v924_v9 = vld [vmem:[%s3175_s5 + $0x10] sm:$0xff] }
 0x236   :  { %1803 = vmatprep.subr.mxu1 %v559_v17  ;;  %1952 = vrcp.f32 %v242_v6  ;;  %v2758_v6 = vld [vmem:[%s3176_s4] ss:$0 sm:$0xff] }
 0x237   :  { %1804 = vmatpush3.msra.mxu1 %v559_v17  ;;  %v923_v17 = vld [vmem:[%s3175_s5 + $0x8] sm:$0xff]  ;;  %v215_v23 = vpop.xlane.xlu0 %214  ;;  %v223_v62 = vpop.xlane.xlu1 %222 }
 0x238   :  { %1805 = vmatprep.subr.mxu1 %v1755_v2  ;;  %v244_v5 = vmax.f32 %v215_v23, 1.0 }
 0x239   :  { %1806 = vmatpush3.msra.mxu1 %v1755_v2  ;;  %v926_v2 = vld [vmem:[%s3175_s5 + $0x20] sm:$0xff] }
 0x23a   :  { %1807 = vmatprep.subr.mxu1 %v549_v7  ;;  %981 = vmatpush1.msra.mxu0 %v926_v2  ;;  %v248_v2 = vmax.f32 %v223_v62, 1.0 }
 0x23b   :  { %1808 = vmatpush3.msra.mxu1 %v549_v7  ;;  %v925_v7 = vld [vmem:[%s3175_s5 + $0x18] sm:$0xff]  ;;  %v217_v58 = vpop.xlane.xlu0 %216 }
 0x23c   :  { %1810 = vmatmul.mubr.msk.f32.vlgmr.msra.gmra.mxu1 %vm163_vm15, %v3226_v3  ;;  %982 = vmatprep.subr.mxu0 %v925_v7  ;;  %v245_v50 = vmax.f32 %v217_v58, 1.0 }
 0x23d   :  { %1812 = vmatprep.mubr.msk.f32.mxu1 %vm164_vm14, %v3226_v3  ;;  %983 = vmatpush1.msra.mxu0 %v924_v9 }
 0x23e   :  { %984 = vmatprep.subr.mxu0 %v923_v17  ;;  %1954 = vrcp.f32 %v245_v50  ;;  %v227_v17 = vpop.xlane.xlu1 %226 }
 0x23f   :  { %985 = vmatpush1.msra.mxu0 %v922_v19  ;;  %v221_v52 = vpop.xlane.xlu0 %220  ;;  %1956 = vrcp.f32 %v244_v5  ;;  %v2748_v9 = vpop.eup %1950  ;;  %v250_v37 = vmax.f32 %v227_v17, 1.0 }
 0x240   :  { %1813 = vmatmul.mubr.msk.f32.gmra.mxu1 %vm165_vm13, %v3226_v3  ;;  %v247_v53 = vmax.f32 %v221_v52, 1.0  ;;  %3227 = vst [vmem:[#allocation8_spill] sm:$0xff] %v2748_v9 }
 0x241   :  { %1815 = vmatprep.mubr.msk.f32.mxu1 %vm166_vm12, %v3226_v3 }
 0x242   :  { %1958 = vrcp.f32 %v247_v53 }
 0x243   :  { %v225_v1 = vpop.xlane.xlu0 %224  ;;  %1960 = vrcp.f32 %v246_v59  ;;  %v2750_v19 = vpop.eup %1952 }
 0x244   :  { %1816 = vmatmul.mubr.msk.f32.gmra.mxu1 %vm167_vm10, %v3226_v3  ;;  %v249_v7 = vmax.f32 %v225_v1, 1.0  ;;  %1962 = vrcp.f32 %v248_v2  ;;  %3228 = vst [vmem:[#allocation9_spill] sm:$0xff] %v2750_v19 }
 0x245   :  { %1818 = vmatprep.mubr.msk.f32.mxu1 %vm168_vm11, %v3226_v3 }
 0x246   :  { %1964 = vrcp.f32 %v249_v7  ;;  %v231_v7 = vpop.xlane.xlu1 %230 }
 0x247   :  { %v229_v31 = vpop.xlane.xlu0 %228  ;;  %1966 = vrcp.f32 %v250_v37  ;;  %v252_v37 = vmax.f32 %v231_v7, 1.0  ;;  %v3265_v60 = vld [vmem:[#allocation8_spill] sm:$0xff] }
 0x248   :  { %1819 = vmatmul.mubr.msk.f32.gmra.mxu1 %vm169_vm8, %v3226_v3  ;;  %v251_v53 = vmax.f32 %v229_v31, 1.0 }
 0x249   :  { %1821 = vmatprep.mubr.msk.f32.mxu1 %vm170_vm9, %v3226_v3 }
 0x24a   :  { %1968 = vrcp.f32 %v251_v53 }
 0x24b   :  { %v2753_v58 = vpop.eup %1954  ;;  %1970 = vrcp.f32 %v252_v37  ;;  %v3266_v27 = vld [vmem:[#allocation9_spill] sm:$0xff] }
 0x24c   :  { %1822 = vmatmul.mubr.msk.f32.gmra.mxu1 %vm171_vm6, %v3226_v3  ;;  %3229 = vst [vmem:[#allocation10_spill] sm:$0xff] %v2753_v58  ;;  %v2762_v52 = vpop.eup %1956 }
 0x24d   :  { %1824 = vmatprep.mubr.msk.f32.mxu1 %vm172_vm7, %v3226_v3  ;;  %3230 = vst [vmem:[#allocation11_spill] sm:$0xff] %v2762_v52 }
 0x250   :  { %1825 = vmatmul.mubr.msk.f32.gmra.mxu1 %vm173_vm4, %v3226_v3 }
 0x251   :  { %1827 = vmatprep.mubr.msk.f32.mxu1 %vm3219_vm5, %v3226_v3  ;;  %vm3243_vm5 = vcmp.eq.s32.totalorder %v2267_v4, %v2319_v42 }
 0x254   :  { %1828 = vmatmul.mubr.msk.f32.gmra.mxu1 %vm3218_vm1, %v3226_v3  ;;  %vm3242_vm1 = vcmp.eq.s32.totalorder %v2267_v4, %v2317_v41  ;;  %v3257_v41 = vld [vmem:[#allocation5_spill] sm:$0xff] }
 0x255   :  { %1830 = vmatprep.mubr.msk.f32.mxu1 %vm3216_vm3, %v3226_v3 }
 0x258   :  { %1831 = vmatmul.mubr.msk.f32.gmra.mxu1 %vm3215_vm2, %v3226_v3 }
 0x259   :  { %1865 = vmatprep.mubr.msk.f32.mxu1 %vm92_vm0, %v3226_v3 }
 0x2fc   :  { %v1811_v21 = vpop.f32.mrf.mxu1 }
 0x2fd   :  { %v774_v23 = vmul.f32 %v2748_v9, %v1811_v21  ;;  %v2769_v21 = vpop.eup %1958 }
 0x2fe   :  { %v694_v50 = vpop.f32.mrf.mxu1  ;;  %3231 = vst [vmem:[#allocation12_spill] sm:$0xff] %v2769_v21 }
 0x2ff   :  { %v790_v51 = vadd.f32 %v774_v23, %v2283_v10  ;;  %v773_v5 = vmul.f32 %v2750_v19, %v694_v50 }
 0x300   :  { %v1814_v59 = vpop.f32.mrf.mxu1 }
 0x301   :  { %v2765_v62 = vadd.f32 %v2758_v6, %v790_v51  ;;  %v789_v1 = vadd.f32 %v773_v5, %v2279_v8  ;;  %v776_v2 = vmul.f32 %v2753_v58, %v1814_v59  ;;  %v2777_v51 = vpop.eup %1960  ;;  %v233_v5 = vpop.xlane.xlu0 %232 }
 0x302   :  { %v704_v17 = vpop.f32.mrf.mxu1  ;;  %3232 = vst [vmem:[#allocation13_spill] sm:$0xff] %v2777_v51  ;;  %v253_v53 = vmax.f32 %v233_v5, 1.0 }
 0x303   :  { %v843_v10 = vmin.f32 %v2765_v62, 0.0  ;;  %v2773_v23 = vadd.f32 %v2758_v6, %v789_v1  ;;  %v792_v31 = vadd.f32 %v776_v2, %v2287_v14  ;;  %v775_v50 = vmul.f32 %v2762_v52, %v704_v17  ;;  %v2789_v17 = vpop.eup %1962 }
 0x304   :  { %v1817_v19 = vpop.f32.mrf.mxu1  ;;  %3233 = vst [vmem:[#allocation14_spill] sm:$0xff] %v2789_v17  ;;  %vm827_vm2 = vcmp.gt.f32.partialorder %v2765_v62, 0.0 }
 0x305   :  { %v842_v8 = vmin.f32 %v2773_v23, 0.0  ;;  %v791_v59 = vadd.f32 %v775_v50, %v2285_v12  ;;  %v860_v58 = vmul.f32 1.442695, %v843_v10  ;;  %v2782_v9 = vadd.f32 %v2758_v6, %v792_v31 }
 0x306   :  { %v778_v1 = vmul.f32 %v2769_v21, %v1817_v19  ;;  %v714_v29 = vpop.f32.mrf.mxu1  ;;  %v2794_v19 = vpop.eup %1964  ;;  %vm826_vm0 = vcmp.gt.f32.partialorder %v2773_v23, 0.0 }
 0x307   :  { %v858_v14 = vmul.f32 1.442695, %v842_v8  ;;  %v2786_v2 = vadd.f32 %v2758_v6, %v791_v59  ;;  %v777_v7 = vmul.f32 %v2777_v51, %v714_v29  ;;  %3234 = vst [vmem:[#allocation15_spill] sm:$0xff] %v2794_v19  ;;  %v845_v50 = vmin.f32 %v2782_v9, 0.0  ;;  %v235_v8 = vpop.xlane.xlu1 %234 }
 0x308   :  { %v1820_v52 = vpop.f32.mrf.mxu1  ;;  %v794_v10 = vadd.f32 %v778_v1, %v2291_v18  ;;  %v237_v18 = vpop.xlane.xlu0 %236 }
 0x309   :  { %1972 = vpow2.f32 %v858_v14  ;;  %v844_v12 = vmin.f32 %v2786_v2, 0.0  ;;  %v793_v31 = vadd.f32 %v777_v7, %v2289_v16  ;;  %v254_v16 = vmax.f32 %v235_v8, 1.0  ;;  %v2805_v7 = vpop.eup %1966 }
 0x30a   :  { %v724_v59 = vpop.f32.mrf.mxu1  ;;  %1974 = vpow2.f32 %v860_v58  ;;  %v2802_v14 = vadd.f32 %v2758_v6, %v794_v10  ;;  %v780_v1 = vmul.f32 %v2794_v19, %v1820_v52  ;;  %3235 = vst [vmem:[#allocation16_spill] sm:$0xff] %v2805_v7  ;;  %v864_v21 = vmul.f32 1.442695, %v845_v50 }
 0x30b   :  { %v862_v29 = vmul.f32 1.442695, %v844_v12  ;;  %v2798_v51 = vadd.f32 %v2758_v6, %v793_v31  ;;  %v779_v37 = vmul.f32 %v2789_v17, %v724_v59  ;;  %1976 = vrcp.f32 %v253_v53  ;;  %v239_v10 = vpop.xlane.xlu1 %238  ;;  %v2812_v17 = vpop.eup %1968 }
 0x30c   :  { %v1823_v5 = vpop.f32.mrf.mxu1  ;;  %v255_v0 = vmax.f32 %v237_v18, 1.0  ;;  %v847_v59 = vmin.f32 %v2802_v14, 0.0  ;;  %v796_v53 = vadd.f32 %v780_v1, %v2295_v22  ;;  %3236 = vst [vmem:[#allocation17_spill] sm:$0xff] %v2812_v17  ;;  %v241_v22 = vpop.xlane.xlu0 %240 }
 0x30d   :  { %v846_v58 = vmin.f32 %v2798_v51, 0.0  ;;  %v795_v12 = vadd.f32 %v779_v37, %v2293_v20  ;;  %1978 = vpow2.f32 %v862_v29  ;;  %v256_v20 = vmax.f32 %v239_v10, 1.0  ;;  %v2817_v29 = vpop.eup %1970 }
 0x30e   :  { %v734_v31 = vpop.f32.mrf.mxu1  ;;  %1980 = vrcp.f32 %v254_v16  ;;  %v868_v37 = vmul.f32 1.442695, %v847_v59  ;;  %v2820_v18 = vadd.f32 %v2758_v6, %v796_v53  ;;  %v782_v16 = vmul.f32 %v2812_v17, %v1823_v5 }
 0x30f   :  { %v781_v8 = vmul.f32 %v2805_v7, %v734_v31  ;;  %v866_v52 = vmul.f32 1.442695, %v846_v58  ;;  %v2815_v50 = vadd.f32 %v2758_v6, %v795_v12  ;;  %1982 = vpow2.f32 %v864_v21 }
 0x310   :  { %v1826_v19 = vpop.f32.mrf.mxu1  ;;  %1984 = vrcp.f32 %v255_v0  ;;  %v257_v21 = vmax.f32 %v241_v22, 1.0  ;;  %v849_v59 = vmin.f32 %v2820_v18, 0.0  ;;  %v798_v53 = vadd.f32 %v782_v16, %v2299_v26 }
 0x311   :  { %v797_v1 = vadd.f32 %v781_v8, %v2297_v24  ;;  %v848_v58 = vmin.f32 %v2815_v50, 0.0  ;;  %1986 = vpow2.f32 %v866_v52 }
 0x312   :  { %v744_v12 = vpop.f32.mrf.mxu1  ;;  %1988 = vrcp.f32 %v256_v20  ;;  %v872_v26 = vmul.f32 1.442695, %v849_v59  ;;  %v2838_v16 = vadd.f32 %v2758_v6, %v798_v53 }
 0x313   :  { %v2829_v10 = vadd.f32 %v2758_v6, %v797_v1  ;;  %1990 = vpow2.f32 %v868_v37  ;;  %v870_v5 = vmul.f32 1.442695, %v848_v58  ;;  %v783_v8 = vmul.f32 %v2817_v29, %v744_v12 }
 0x314   :  { %v1829_v52 = vpop.f32.mrf.mxu1  ;;  %1992 = vrcp.f32 %v257_v21  ;;  %v851_v53 = vmin.f32 %v2838_v16, 0.0  ;;  %vm835_vm3 = vcmp.gt.f32.partialorder %v2838_v16, 0.0 }
 0x315   :  { %v850_v37 = vmin.f32 %v2829_v10, 0.0  ;;  %1994 = vpow2.f32 %v870_v5 }
 0x316   :  { %v1973_v31 = vpop.eup %1972  ;;  %1996 = vpow2.f32 %v872_v26 }
 0x317   :  { %v1975_v7 = vpop.eup %1974  ;;  %v1544_v0 = vadd.f32 -1.0, %v1973_v31  ;;  %v3237_v31 = vmov 0.0  }
 0x318   :  { %v2831_v24 = vpop.eup %1976  ;;  %v1545_v20 = vadd.f32 -1.0, %v1975_v7  ;;  %v754_v7 = vpop.f32.mrf.mxu1 }
 0x319   :  { %v906_v22 = vsel %vm826_vm0, %v2773_v23, %v1544_v0  ;;  %v784_v1 = vmul.f32 %v2831_v24, %v1826_v19  ;;  %v799_v23 = vadd.f32 %v783_v8, %v2301_v28  ;;  %vm828_vm0 = vcmp.gt.f32.partialorder %v2786_v2, 0.0 }
 0x31a   :  { %v1979_v17 = vpop.eup %1978  ;;  %1019 = vmatmul.mubr.f32.vlgmr.msra.gmra.mxu0 %v906_v22  ;;  %v907_v12 = vsel %vm827_vm2, %v2765_v62, %v1545_v20  ;;  %v874_v28 = vmul.f32 1.442695, %v850_v37  ;;  %v1832_v20 = vpop.f32.mrf.mxu1  ;;  %vm829_vm2 = vcmp.gt.f32.partialorder %v2782_v9, 0.0 }
 0x31b   :  { %1024 = vmatprep.mubr.f32.mxu0 %v3237_v31  ;;  %v2842_v58 = vpop.eup %1980  ;;  %v1546_v21 = vadd.f32 -1.0, %v1979_v17  ;;  %v800_v19 = vadd.f32 %v784_v1, %v2303_v30  ;;  %v2854_v62 = vadd.f32 %v2758_v6, %v799_v23  ;;  %v876_v30 = vmul.f32 1.442695, %v851_v53 }
 0x31c   :  { %v1983_v0 = vpop.eup %1982  ;;  %v785_v22 = vmul.f32 %v2842_v58, %v754_v7  ;;  %1998 = vpow2.f32 %v874_v28 }
 0x31d   :  { %v2848_v59 = vpop.eup %1984  ;;  %v908_v17 = vsel %vm828_vm0, %v2786_v2, %v1546_v21  ;;  %v1547_v5 = vadd.f32 -1.0, %v1983_v0  ;;  %v2862_v1 = vadd.f32 %v2758_v6, %v800_v19  ;;  %v852_v2 = vmin.f32 %v2854_v62, 0.0  ;;  %v764_v0 = vpop.f32.mrf.mxu1 }
 0x31e   :  { %1025 = vmatmul.mubr.f32.gmra.mxu0 %v907_v12  ;;  %v1987_v8 = vpop.eup %1986  ;;  %v786_v26 = vmul.f32 %v2848_v59, %v1829_v52  ;;  %v801_v37 = vadd.f32 %v785_v22, %v2305_v32  ;;  %vm830_vm0 = vcmp.gt.f32.partialorder %v2798_v51, 0.0  ;;  %2000 = vpow2.f32 %v876_v30 }
 0x31f   :  { %1030 = vmatprep.mubr.f32.mxu0 %v3237_v31  ;;  %v2859_v12 = vpop.eup %1988  ;;  %v909_v7 = vsel %vm829_vm2, %v2782_v9, %v1547_v5  ;;  %v1548_v21 = vadd.f32 -1.0, %v1987_v8  ;;  %v853_v19 = vmin.f32 %v2862_v1, 0.0  ;;  %v878_v22 = vmul.f32 1.442695, %v852_v2  ;;  %v480_v2 = vpop.f32.mrf.mxu0 }
 0x320   :  { %3238 = vst [vmem:[#allocation18_spill] sm:$0xff] %v2859_v12  ;;  %v1991_v23 = vpop.eup %1990  ;;  %v802_v52 = vadd.f32 %v786_v26, %v2307_v34  ;;  %v2875_v32 = vadd.f32 %v2758_v6, %v801_v37  ;;  %v787_v9 = vmul.f32 %v2859_v12, %v764_v0  ;;  %vm831_vm2 = vcmp.gt.f32.partialorder %v2802_v14, 0.0 }
 0x321   :  { %v2870_v53 = vpop.eup %1992  ;;  %v910_v28 = vsel %vm830_vm0, %v2798_v51, %v1548_v21  ;;  %v880_v8 = vmul.f32 1.442695, %v853_v19  ;;  %2002 = vpow2.f32 %v878_v22  ;;  %vm832_vm0 = vcmp.gt.f32.partialorder %v2815_v50, 0.0 }
 0x322   :  { %1031 = vmatmul.mubr.f32.gmra.mxu0 %v908_v17  ;;  %v1549_v17 = vadd.f32 -1.0, %v1991_v23  ;;  %v1995_v5 = vpop.eup %1994  ;;  %v854_v34 = vmin.f32 %v2875_v32, 0.0  ;;  %v788_v30 = vmul.f32 %v2870_v53, %v1832_v20  ;;  %v803_v37 = vadd.f32 %v787_v9, %v2309_v36 }
 0x323   :  { %1036 = vmatprep.mubr.f32.mxu0 %v3237_v31  ;;  %v1997_v26 = vpop.eup %1996  ;;  %v1550_v23 = vadd.f32 -1.0, %v1995_v5  ;;  %2004 = vpow2.f32 %v880_v8 }
 0x324   :  { %v911_v51 = vsel %vm831_vm2, %v2802_v14, %v1549_v17  ;;  %v882_v0 = vmul.f32 1.442695, %v854_v34  ;;  %v804_v19 = vadd.f32 %v788_v30, %v480_v2  ;;  %vm833_vm2 = vcmp.gt.f32.partialorder %v2820_v18, 0.0 }
 0x325   :  { %v912_v20 = vsel %vm832_vm0, %v2815_v50, %v1550_v23  ;;  %vm834_vm0 = vcmp.gt.f32.partialorder %v2829_v10, 0.0 }
 0x326   :  { %1037 = vmatmul.mubr.f32.gmra.mxu0 %v909_v7  ;;  %v2882_v7 = vadd.f32 %v2758_v6, %v802_v52  ;;  %v824_v52 = vadd.f32 %v2758_v6, %v803_v37  ;;  %v825_v22 = vadd.f32 %v2758_v6, %v804_v19  ;;  %2006 = vpow2.f32 %v882_v0 }
 0x327   :  { %1042 = vmatprep.mubr.f32.mxu0 %v3237_v31 }
 0x328   :  { %v855_v21 = vmin.f32 %v2882_v7, 0.0  ;;  %v856_v17 = vmin.f32 %v824_v52, 0.0  ;;  %v857_v50 = vmin.f32 %v825_v22, 0.0 }
 0x329   :  { %v1999_v36 = vpop.eup %1998 }
 0x32a   :  { %1043 = vmatmul.mubr.f32.gmra.mxu0 %v910_v28  ;;  %v1551_v28 = vadd.f32 -1.0, %v1997_v26  ;;  %v884_v14 = vmul.f32 1.442695, %v855_v21  ;;  %v1552_v34 = vadd.f32 -1.0, %v1999_v36  ;;  %v886_v8 = vmul.f32 1.442695, %v856_v17 }
 0x32b   :  { %1048 = vmatprep.mubr.f32.mxu0 %v3237_v31  ;;  %v2001_v9 = vpop.eup %2000 }
 0x32c   :  { %v913_v5 = vsel %vm833_vm2, %v2820_v18, %v1551_v28  ;;  %v914_v30 = vsel %vm834_vm0, %v2829_v10, %v1552_v34  ;;  %v1553_v26 = vadd.f32 -1.0, %v2001_v9  ;;  %2008 = vpow2.f32 %v884_v14 }
 0x32d   :  { %v888_v18 = vmul.f32 1.442695, %v857_v50  ;;  %2010 = vpow2.f32 %v886_v8  ;;  %vm836_vm2 = vcmp.gt.f32.partialorder %v2854_v62, 0.0  ;;  %vm837_vm0 = vcmp.gt.f32.partialorder %v2862_v1, 0.0 }
 0x32e   :  { %1049 = vmatmul.mubr.f32.gmra.mxu0 %v911_v51  ;;  %v2003_v6 = vpop.eup %2002  ;;  %v915_v37 = vsel %vm835_vm3, %v2838_v16, %v1553_v26  ;;  %vm838_vm3 = vcmp.gt.f32.partialorder %v2875_v32, 0.0 }
 0x32f   :  { %1054 = vmatprep.mubr.f32.mxu0 %v3237_v31  ;;  %v1554_v51 = vadd.f32 -1.0, %v2003_v6  ;;  %2012 = vpow2.f32 %v888_v18 }
 0x330   :  { %v2005_v23 = vpop.eup %2004 }
 0x331   :  { %v916_v10 = vsel %vm836_vm2, %v2854_v62, %v1554_v51  ;;  %v1555_v2 = vadd.f32 -1.0, %v2005_v23  ;;  %vm839_vm2 = vcmp.gt.f32.partialorder %v2882_v7, 0.0 }
 0x332   :  { %1055 = vmatmul.mubr.f32.gmra.mxu0 %v912_v20 }
 0x333   :  { %1060 = vmatprep.mubr.f32.mxu0 %v3237_v31  ;;  %v2007_v21 = vpop.eup %2006  ;;  %v917_v16 = vsel %vm837_vm0, %v2862_v1, %v1555_v2  ;;  %vm840_vm0 = vcmp.gt.f32.partialorder %v824_v52, 0.0 }
 0x334   :  { %v1556_v0 = vadd.f32 -1.0, %v2007_v21 }
 0x336   :  { %1061 = vmatmul.mubr.f32.gmra.mxu0 %v913_v5  ;;  %v918_v20 = vsel %vm838_vm3, %v2875_v32, %v1556_v0  ;;  %vm841_vm3 = vcmp.gt.f32.partialorder %v825_v22, 0.0 }
 0x337   :  { %1066 = vmatprep.mubr.f32.mxu0 %v3237_v31 }
 0x339   :  { %v2009_v19 = vpop.eup %2008 }
 0x33a   :  { %1067 = vmatmul.mubr.f32.gmra.mxu0 %v914_v30  ;;  %v1557_v62 = vadd.f32 -1.0, %v2009_v19  ;;  %v2011_v28 = vpop.eup %2010 }
 0x33b   :  { %1072 = vmatprep.mubr.f32.mxu0 %v3237_v31  ;;  %v1558_v14 = vadd.f32 -1.0, %v2011_v28 }
 0x33c   :  { %v919_v36 = vsel %vm839_vm2, %v2882_v7, %v1557_v62  ;;  %v2013_v1 = vpop.eup %2012  ;;  %vm3239_vm2 = vcmp.eq.s32.totalorder %v2267_v4, %v2313_v39  ;;  %v3253_v39 = vld [vmem:[#allocation3_spill] sm:$0xff] }
 0x33d   :  { %v920_v9 = vsel %vm840_vm0, %v824_v52, %v1558_v14  ;;  %v1559_v17 = vadd.f32 -1.0, %v2013_v1  ;;  %vm3240_vm0 = vcmp.eq.s32.totalorder %v2267_v4, %v2311_v38  ;;  %v3251_v38 = vld [vmem:[#allocation2_spill] sm:$0xff] }
 0x33e   :  { %1073 = vmatmul.mubr.f32.gmra.mxu0 %v915_v37 }
 0x33f   :  { %1078 = vmatprep.mubr.f32.mxu0 %v3237_v31  ;;  %v921_v32 = vsel %vm841_vm3, %v825_v22, %v1559_v17  ;;  %vm3241_vm3 = vcmp.eq.s32.totalorder %v2267_v4, %v2315_v40  ;;  %v3255_v40 = vld [vmem:[#allocation4_spill] sm:$0xff] }
 0x342   :  { %1079 = vmatmul.mubr.f32.gmra.mxu0 %v916_v10 }
 0x343   :  { %1084 = vmatprep.mubr.f32.mxu0 %v3237_v31 }
 0x346   :  { %1085 = vmatmul.mubr.f32.gmra.mxu0 %v917_v16 }
 0x347   :  { %1090 = vmatprep.mubr.f32.mxu0 %v3237_v31 }
 0x34a   :  { %1091 = vmatmul.mubr.f32.gmra.mxu0 %v918_v20 }
 0x34b   :  { %1096 = vmatprep.mubr.f32.mxu0 %v3237_v31 }
 0x34e   :  { %1097 = vmatmul.mubr.f32.gmra.mxu0 %v919_v36 }
 0x34f   :  { %1102 = vmatprep.mubr.f32.mxu0 %v3237_v31 }
 0x352   :  { %1103 = vmatmul.mubr.f32.gmra.mxu0 %v920_v9 }
 0x353   :  { %1108 = vmatprep.mubr.f32.mxu0 %v3237_v31 }
 0x356   :  { %1109 = vmatmul.mubr.f32.gmra.mxu0 %v921_v32 }
 0x3da   :  { %v1020_v5 = vpop.f32.mrf.mxu0 }
 0x3dc   :  { %v2917_v34 = vpop.f32.mrf.mxu0 }
 0x3de   :  { %v1026_v50 = vpop.f32.mrf.mxu0 }
 0x3e0   :  { %v2919_v8 = vpop.f32.mrf.mxu0 }
 0x3e2   :  { %v1032_v7 = vpop.f32.mrf.mxu0 }
 0x3e4   :  { %v2921_v30 = vpop.f32.mrf.mxu0 }
 0x3e6   :  { %v1038_v26 = vpop.f32.mrf.mxu0 }
 0x3e8   :  { %v2923_v6 = vpop.f32.mrf.mxu0 }
 0x3ea   :  { %v1044_v52 = vpop.f32.mrf.mxu0 }
 0x3ec   :  { %v2925_v18 = vpop.f32.mrf.mxu0 }
 0x3ee   :  { %v1050_v37 = vpop.f32.mrf.mxu0 }
 0x3f0   :  { %v2927_v31 = vpop.f32.mrf.mxu0 }
 0x3f2   :  { %v1056_v22 = vpop.f32.mrf.mxu0 }
 0x3f4   :  { %v2929_v51 = vpop.f32.mrf.mxu0 }
 0x3f6   :  { %v1062_v23 = vpop.f32.mrf.mxu0 }
 0x3f8   :  { %v2931_v10 = vpop.f32.mrf.mxu0 }
 0x3fa   :  { %v1068_v2 = vpop.f32.mrf.mxu0 }
 0x3fc   :  { %v2933_v21 = vpop.f32.mrf.mxu0 }
 0x3fe   :  { %v1074_v16 = vpop.f32.mrf.mxu0 }
 0x400   :  { %v2935_v0 = vpop.f32.mrf.mxu0 }
 0x402   :  { %v1080_v19 = vpop.f32.mrf.mxu0 }
 0x404   :  { %v2937_v20 = vpop.f32.mrf.mxu0 }
 0x406   :  { %v1086_v62 = vpop.f32.mrf.mxu0 }
 0x408   :  { %v2939_v28 = vpop.f32.mrf.mxu0 }
 0x40a   :  { %v1092_v36 = vpop.f32.mrf.mxu0 }
 0x40c   :  { %v2941_v14 = vpop.f32.mrf.mxu0 }
 0x40e   :  { %v1098_v1 = vpop.f32.mrf.mxu0 }
 0x410   :  { %v2943_v9 = vpop.f32.mrf.mxu0 }
 0x412   :  { %v1104_v17 = vpop.f32.mrf.mxu0 }
 0x414   :  { %v2945_v32 = vpop.f32.mrf.mxu0 }
 0x416   :  { %v1110_v12 = vpop.f32.mrf.mxu0 }
 0x417   :  { %1833 = vmatprep.subr.mxu1 %v1110_v12 }
 0x418   :  { %1834 = vmatpush3.msra.mxu1 %v1110_v12 }
 0x419   :  { %1835 = vmatprep.subr.mxu1 %v1104_v17 }
 0x41a   :  { %1836 = vmatpush3.msra.mxu1 %v1104_v17 }
 0x41b   :  { %1837 = vmatprep.subr.mxu1 %v1098_v1 }
 0x41c   :  { %1838 = vmatpush3.msra.mxu1 %v1098_v1 }
 0x41d   :  { %1839 = vmatprep.subr.mxu1 %v1092_v36 }
 0x41e   :  { %1840 = vmatpush3.msra.mxu1 %v1092_v36  ;;  %v3269_v36 = vld [vmem:[#allocation12_spill] sm:$0xff] }
 0x41f   :  { %1841 = vmatprep.subr.mxu1 %v1086_v62 }
 0x420   :  { %1842 = vmatpush3.msra.mxu1 %v1086_v62 }
 0x421   :  { %1843 = vmatprep.subr.mxu1 %v1080_v19 }
 0x422   :  { %1844 = vmatpush3.msra.mxu1 %v1080_v19 }
 0x423   :  { %1845 = vmatprep.subr.mxu1 %v1074_v16 }
 0x424   :  { %1846 = vmatpush3.msra.mxu1 %v1074_v16  ;;  %v3268_v16 = vld [vmem:[#allocation11_spill] sm:$0xff] }
 0x425   :  { %1847 = vmatprep.subr.mxu1 %v1068_v2 }
 0x426   :  { %1848 = vmatpush3.msra.mxu1 %v1068_v2 }
 0x427   :  { %1849 = vmatprep.subr.mxu1 %v1062_v23 }
 0x428   :  { %1850 = vmatpush3.msra.mxu1 %v1062_v23 }
 0x429   :  { %1851 = vmatprep.subr.mxu1 %v1056_v22 }
 0x42a   :  { %1852 = vmatpush3.msra.mxu1 %v1056_v22 }
 0x42b   :  { %1853 = vmatprep.subr.mxu1 %v1050_v37 }
 0x42c   :  { %1854 = vmatpush3.msra.mxu1 %v1050_v37 }
 0x42d   :  { %1855 = vmatprep.subr.mxu1 %v1044_v52 }
 0x42e   :  { %1856 = vmatpush3.msra.mxu1 %v1044_v52 }
 0x42f   :  { %1857 = vmatprep.subr.mxu1 %v1038_v26 }
 0x430   :  { %1858 = vmatpush3.msra.mxu1 %v1038_v26 }
 0x431   :  { %1859 = vmatprep.subr.mxu1 %v1032_v7 }
 0x432   :  { %1860 = vmatpush3.msra.mxu1 %v1032_v7 }
 0x433   :  { %1861 = vmatprep.subr.mxu1 %v1026_v50 }
 0x434   :  { %1862 = vmatpush3.msra.mxu1 %v1026_v50 }
 0x435   :  { %1863 = vmatprep.subr.mxu1 %v1020_v5 }
 0x436   :  { %1864 = vmatpush3.msra.mxu1 %v1020_v5 }
 0x437   :  { %1866 = vmatmul.mubr.msk.f32.vlgmr.msra.gmra.mxu1 %vm3239_vm2, %v3226_v3  ;;  %vm3244_vm2 = vcmp.eq.s32.totalorder %v2267_v4, %v2322_v43 }
 0x438   :  { %1868 = vmatprep.mubr.msk.f32.mxu1 %vm3240_vm0, %v3226_v3  ;;  %vm3245_vm0 = vcmp.eq.s32.totalorder %v2267_v4, %v2331_v44 }
 0x43b   :  { %1869 = vmatmul.mubr.msk.f32.gmra.mxu1 %vm3241_vm3, %v3226_v3  ;;  %vm3246_vm3 = vcmp.eq.s32.totalorder %v2267_v4, %v2343_v45 }
 0x43c   :  { %1871 = vmatprep.mubr.msk.f32.mxu1 %vm3242_vm1, %v3226_v3  ;;  %vm3247_vm1 = vcmp.eq.s32.totalorder %v2267_v4, %v2355_v46 }
 0x43f   :  { %1872 = vmatmul.mubr.msk.f32.gmra.mxu1 %vm3243_vm5, %v3226_v3  ;;  %vm3248_vm5 = vcmp.eq.s32.totalorder %v2267_v4, %v2365_v47 }
 0x440   :  { %1874 = vmatprep.mubr.msk.f32.mxu1 %vm3244_vm2, %v3226_v3  ;;  %vm3249_vm2 = vcmp.eq.s32.totalorder %v2267_v4, %v2375_v48 }
 0x443   :  { %1875 = vmatmul.mubr.msk.f32.gmra.mxu1 %vm3245_vm0, %v3226_v3  ;;  %vm3250_vm0 = vcmp.eq.s32.totalorder %v2267_v4, %v2387_v49 }
 0x444   :  { %1877 = vmatprep.mubr.msk.f32.mxu1 %vm3246_vm3, %v3226_v3  ;;  %vm3252_vm3 = vcmp.eq.s32.totalorder %v2267_v4, %v3251_v38 }
 0x447   :  { %1878 = vmatmul.mubr.msk.f32.gmra.mxu1 %vm3247_vm1, %v3226_v3  ;;  %vm3254_vm1 = vcmp.eq.s32.totalorder %v2267_v4, %v3253_v39  ;;  %v3270_v39 = vld [vmem:[#allocation13_spill] sm:$0xff] }
 0x448   :  { %1880 = vmatprep.mubr.msk.f32.mxu1 %vm3248_vm5, %v3226_v3  ;;  %vm3256_vm5 = vcmp.eq.s32.totalorder %v2267_v4, %v3255_v40 }
 0x44b   :  { %1881 = vmatmul.mubr.msk.f32.gmra.mxu1 %vm3249_vm2, %v3226_v3  ;;  %vm3258_vm2 = vcmp.eq.s32.totalorder %v3257_v41, %v2441_v54 }
 0x44c   :  { %1883 = vmatprep.mubr.msk.f32.mxu1 %vm3250_vm0, %v3226_v3 }
 0x44f   :  { %1884 = vmatmul.mubr.msk.f32.gmra.mxu1 %vm3252_vm3, %v3226_v3 }
 0x450   :  { %1886 = vmatprep.mubr.msk.f32.mxu1 %vm3254_vm1, %v3226_v3 }
 0x453   :  { %1887 = vmatmul.mubr.msk.f32.gmra.mxu1 %vm3256_vm5, %v3226_v3 }
 0x454   :  { %1921 = vmatprep.mubr.msk.f32.mxu1 %vm3258_vm2, %v3226_v3 }
 0x4f7   :  { %v1867_v42 = vpop.f32.mrf.mxu1 }
 0x4f9   :  { %v1181_v43 = vpop.f32.mrf.mxu1 }
 0x4fb   :  { %v1870_v44 = vpop.f32.mrf.mxu1 }
 0x4fd   :  { %v1191_v45 = vpop.f32.mrf.mxu1 }
 0x4ff   :  { %v1873_v46 = vpop.f32.mrf.mxu1 }
 0x501   :  { %v1201_v47 = vpop.f32.mrf.mxu1 }
 0x503   :  { %v1876_v48 = vpop.f32.mrf.mxu1 }
 0x505   :  { %v1211_v49 = vpop.f32.mrf.mxu1 }
 0x507   :  { %v1879_v12 = vpop.f32.mrf.mxu1 }
 0x509   :  { %v1221_v5 = vpop.f32.mrf.mxu1 }
 0x50b   :  { %v1882_v50 = vpop.f32.mrf.mxu1 }
 0x50d   :  { %v1231_v7 = vpop.f32.mrf.mxu1 }
 0x50f   :  { %v1885_v26 = vpop.f32.mrf.mxu1 }
 0x511   :  { %v1241_v4 = vpop.f32.mrf.mxu1 }
 0x513   :  { %v1888_v52 = vpop.f32.mrf.mxu1 }
 0x514   :  { %1889 = vmatprep.subr.mxu1 %v1888_v52 }
 0x515   :  { %v1251_v37 = vpop.f32.mrf.mxu1  ;;  %1890 = vmatpush3.msra.mxu1 %v1888_v52 }
 0x516   :  { %1891 = vmatprep.subr.mxu1 %v1251_v37 }
 0x517   :  { %1892 = vmatpush3.msra.mxu1 %v1251_v37 }
 0x518   :  { %1893 = vmatprep.subr.mxu1 %v1885_v26 }
 0x519   :  { %1894 = vmatpush3.msra.mxu1 %v1885_v26 }
 0x51a   :  { %1895 = vmatprep.subr.mxu1 %v1241_v4 }
 0x51b   :  { %1896 = vmatpush3.msra.mxu1 %v1241_v4  ;;  %v3274_v4 = vld [vmem:[#allocation16_spill] sm:$0xff] }
 0x51c   :  { %1897 = vmatprep.subr.mxu1 %v1882_v50 }
 0x51d   :  { %1898 = vmatpush3.msra.mxu1 %v1882_v50 }
 0x51e   :  { %1899 = vmatprep.subr.mxu1 %v1231_v7 }
 0x51f   :  { %1900 = vmatpush3.msra.mxu1 %v1231_v7 }
 0x520   :  { %1901 = vmatprep.subr.mxu1 %v1879_v12 }
 0x521   :  { %1902 = vmatpush3.msra.mxu1 %v1879_v12 }
 0x522   :  { %1903 = vmatprep.subr.mxu1 %v1221_v5 }
 0x523   :  { %1904 = vmatpush3.msra.mxu1 %v1221_v5  ;;  %v3273_v5 = vld [vmem:[#allocation17_spill] sm:$0xff] }
 0x524   :  { %1905 = vmatprep.subr.mxu1 %v1876_v48 }
 0x525   :  { %1906 = vmatpush3.msra.mxu1 %v1876_v48 }
 0x526   :  { %1907 = vmatprep.subr.mxu1 %v1211_v49 }
 0x527   :  { %1908 = vmatpush3.msra.mxu1 %v1211_v49 }
 0x528   :  { %1909 = vmatprep.subr.mxu1 %v1873_v46 }
 0x529   :  { %1910 = vmatpush3.msra.mxu1 %v1873_v46 }
 0x52a   :  { %1911 = vmatprep.subr.mxu1 %v1201_v47 }
 0x52b   :  { %1912 = vmatpush3.msra.mxu1 %v1201_v47  ;;  %v3272_v47 = vld [vmem:[#allocation14_spill] sm:$0xff] }
 0x52c   :  { %1913 = vmatprep.subr.mxu1 %v1870_v44 }
 0x52d   :  { %1914 = vmatpush3.msra.mxu1 %v1870_v44 }
 0x52e   :  { %1915 = vmatprep.subr.mxu1 %v1191_v45 }
 0x52f   :  { %1916 = vmatpush3.msra.mxu1 %v1191_v45 }
 0x530   :  { %1917 = vmatprep.subr.mxu1 %v1867_v42 }
 0x531   :  { %1918 = vmatpush3.msra.mxu1 %v1867_v42 }
 0x532   :  { %1919 = vmatprep.subr.mxu1 %v1181_v43 }
 0x533   :  { %1920 = vmatpush3.msra.mxu1 %v1181_v43  ;;  %v3271_v43 = vld [vmem:[#allocation15_spill] sm:$0xff] }
 0x534   :  { %1922 = vmatmul.mubr.msk.f32.vlgmr.msra.gmra.mxu1 %vm163_vm15, %v3226_v3 }
 0x535   :  { %1924 = vmatprep.mubr.msk.f32.mxu1 %vm164_vm14, %v3226_v3 }
 0x538   :  { %1925 = vmatmul.mubr.msk.f32.gmra.mxu1 %vm165_vm13, %v3226_v3 }
 0x539   :  { %1927 = vmatprep.mubr.msk.f32.mxu1 %vm166_vm12, %v3226_v3 }
 0x53c   :  { %1928 = vmatmul.mubr.msk.f32.gmra.mxu1 %vm167_vm10, %v3226_v3 }
 0x53d   :  { %1930 = vmatprep.mubr.msk.f32.mxu1 %vm168_vm11, %v3226_v3 }
 0x540   :  { %1931 = vmatmul.mubr.msk.f32.gmra.mxu1 %vm169_vm8, %v3226_v3  ;;  %vm3259_vm8 = vcmp.eq.s32.totalorder %v2554_v35, %v2441_v54 }
 0x541   :  { %1933 = vmatprep.mubr.msk.f32.mxu1 %vm170_vm9, %v3226_v3  ;;  %vm3260_vm9 = vcmp.eq.s32.totalorder %v2597_v15, %v2441_v54 }
 0x544   :  { %1934 = vmatmul.mubr.msk.f32.gmra.mxu1 %vm171_vm6, %v3226_v3  ;;  %vm3262_vm6 = vcmp.eq.s32.totalorder %v3261_v55, %v2441_v54 }
 0x545   :  { %1936 = vmatprep.mubr.msk.f32.mxu1 %vm172_vm7, %v3226_v3  ;;  %vm3264_vm7 = vcmp.eq.s32.totalorder %v3263_v56, %v2441_v54  ;;  %v3267_v54 = vld [vmem:[#allocation10_spill] sm:$0xff] }
 0x548   :  { %1937 = vmatmul.mubr.msk.f32.gmra.mxu1 %vm173_vm4, %v3226_v3 }
 0x549   :  { %1939 = vmatprep.mubr.msk.f32.mxu1 %vm3259_vm8, %v3226_v3 }
 0x54c   :  { %1940 = vmatmul.mubr.msk.f32.gmra.mxu1 %vm3260_vm9, %v3226_v3 }
 0x54d   :  { %1942 = vmatprep.mubr.msk.f32.mxu1 %vm3262_vm6, %v3226_v3 }
 0x550   :  { %1943 = vmatmul.mubr.msk.f32.gmra.mxu1 %vm3264_vm7, %v3226_v3 }
 0x5f4   :  { %v1923_v57 = vpop.f32.mrf.mxu1 }
 0x5f5   :  { %v1406_v61 = vmul.f32 %v3265_v60, %v1923_v57 }
 0x5f6   :  { %v1326_v13 = vpop.f32.mrf.mxu1 }
 0x5f7   :  { %v1422_v25 = vadd.f32 %v1406_v61, %v2919_v8  ;;  %v1405_v33 = vmul.f32 %v3266_v27, %v1326_v13 }
 0x5f8   :  { %v1926_v35 = vpop.f32.mrf.mxu1 }
 0x5f9   :  { %v1443_v63 = vadd.f32 %v3075_v11, %v1422_v25  ;;  %v1421_v15 = vadd.f32 %v1405_v33, %v2917_v34  ;;  %v1408_v3 = vmul.f32 %v3267_v54, %v1926_v35 }
 0x5fa   :  { %v1336_v22 = vpop.f32.mrf.mxu1 }
 0x5fb   :  { %1459 = vst [vmem:[%s3178_s7 + $0x8] sm:$0xff] %v1443_v63  ;;  %v1442_v23 = vadd.f32 %v3075_v11, %v1421_v15  ;;  %v1424_v2 = vadd.f32 %v1408_v3, %v2923_v6  ;;  %v1407_v8 = vmul.f32 %v3268_v16, %v1336_v22  ;;  %v1112_v15 = vpop.f32.mrf.mxu0  ;;  %v3275_v3 = vld [vmem:[#allocation18_spill] sm:$0xff] }
 0x5fc   :  { %v1929_v19 = vpop.f32.mrf.mxu1 }
 0x5fd   :  { %1458 = vst [vmem:[%s3178_s7] sm:$0xff] %v1442_v23  ;;  %v1445_v34 = vadd.f32 %v3075_v11, %v1424_v2  ;;  %v1423_v62 = vadd.f32 %v1407_v8, %v2921_v30  ;;  %v1410_v1 = vmul.f32 %v3269_v36, %v1929_v19 }
 0x5fe   :  { %v1346_v17 = vpop.f32.mrf.mxu1 }
 0x5ff   :  { %1461 = vst [vmem:[%s3178_s7 + $0x18] sm:$0xff] %v1445_v34  ;;  %v1444_v6 = vadd.f32 %v3075_v11, %v1423_v62  ;;  %v1426_v38 = vadd.f32 %v1410_v1, %v2927_v31  ;;  %v1409_v40 = vmul.f32 %v3270_v39, %v1346_v17 }
 0x600   :  { %v1932_v41 = vpop.f32.mrf.mxu1 }
 0x601   :  { %1460 = vst [vmem:[%s3178_s7 + $0x10] sm:$0xff] %v1444_v6  ;;  %v1447_v30 = vadd.f32 %v3075_v11, %v1426_v38  ;;  %v1425_v42 = vadd.f32 %v1409_v40, %v2925_v18  ;;  %v1412_v44 = vmul.f32 %v3271_v43, %v1932_v41 }
 0x602   :  { %v1356_v45 = vpop.f32.mrf.mxu1 }
 0x603   :  { %1463 = vst [vmem:[%s3178_s7 + $0x28] sm:$0xff] %v1447_v30  ;;  %v1446_v31 = vadd.f32 %v3075_v11, %v1425_v42  ;;  %v1428_v46 = vadd.f32 %v1412_v44, %v2931_v10  ;;  %v1411_v48 = vmul.f32 %v3272_v47, %v1356_v45 }
 0x604   :  { %v1935_v49 = vpop.f32.mrf.mxu1 }
 0x605   :  { %1462 = vst [vmem:[%s3178_s7 + $0x20] sm:$0xff] %v1446_v31  ;;  %v1449_v18 = vadd.f32 %v3075_v11, %v1428_v46  ;;  %v1427_v12 = vadd.f32 %v1411_v48, %v2929_v51  ;;  %v1414_v50 = vmul.f32 %v3273_v5, %v1935_v49 }
 0x606   :  { %v1366_v7 = vpop.f32.mrf.mxu1 }
 0x607   :  { %1465 = vst [vmem:[%s3178_s7 + $0x38] sm:$0xff] %v1449_v18  ;;  %v1448_v10 = vadd.f32 %v3075_v11, %v1427_v12  ;;  %v1430_v26 = vadd.f32 %v1414_v50, %v2935_v0  ;;  %v1413_v52 = vmul.f32 %v3274_v4, %v1366_v7 }
 0x608   :  { %v1938_v37 = vpop.f32.mrf.mxu1 }
 0x609   :  { %1464 = vst [vmem:[%s3178_s7 + $0x30] sm:$0xff] %v1448_v10  ;;  %v1451_v51 = vadd.f32 %v3075_v11, %v1430_v26  ;;  %v1429_v55 = vadd.f32 %v1413_v52, %v2933_v21  ;;  %v1416_v56 = vmul.f32 %v2831_v24, %v1938_v37 }
 0x60a   :  { %v1376_v57 = vpop.f32.mrf.mxu1 }
 0x60b   :  { %1467 = vst [vmem:[%s3178_s7 + $0x48] sm:$0xff] %v1451_v51  ;;  %v1450_v0 = vadd.f32 %v3075_v11, %v1429_v55  ;;  %v1432_v60 = vadd.f32 %v1416_v56, %v2939_v28  ;;  %v1415_v61 = vmul.f32 %v2817_v29, %v1376_v57 }
 0x60c   :  { %v1941_v13 = vpop.f32.mrf.mxu1 }
 0x60d   :  { %1466 = vst [vmem:[%s3178_s7 + $0x40] sm:$0xff] %v1450_v0  ;;  %v1453_v21 = vadd.f32 %v3075_v11, %v1432_v60  ;;  %v1431_v24 = vadd.f32 %v1415_v61, %v2937_v20  ;;  %v1418_v25 = vmul.f32 %v2848_v59, %v1941_v13 }
 0x60e   :  { %v1386_v27 = vpop.f32.mrf.mxu1 }
 0x60f   :  { %1469 = vst [vmem:[%s3178_s7 + $0x58] sm:$0xff] %v1453_v21  ;;  %v1452_v28 = vadd.f32 %v3075_v11, %v1431_v24  ;;  %v1434_v29 = vadd.f32 %v1418_v25, %v2943_v9  ;;  %v1417_v33 = vmul.f32 %v2842_v58, %v1386_v27 }
 0x610   :  { %v1944_v35 = vpop.f32.mrf.mxu1 }
 0x611   :  { %1468 = vst [vmem:[%s3178_s7 + $0x50] sm:$0xff] %v1452_v28  ;;  %v1455_v20 = vadd.f32 %v3075_v11, %v1434_v29  ;;  %v1433_v59 = vadd.f32 %v1417_v33, %v2941_v14  ;;  %v1420_v63 = vmul.f32 %v2870_v53, %v1944_v35 }
 0x612   :  { %v1396_v54 = vpop.f32.mrf.mxu1 }
 0x613   :  { %1471 = vst [vmem:[%s3178_s7 + $0x68] sm:$0xff] %v1455_v20  ;;  %v1454_v9 = vadd.f32 %v3075_v11, %v1433_v59  ;;  %v1436_v58 = vadd.f32 %v1420_v63, %v1112_v15  ;;  %v1419_v22 = vmul.f32 %v3275_v3, %v1396_v54 }
 0x615   :  { %1470 = vst [vmem:[%s3178_s7 + $0x60] sm:$0xff] %v1454_v9  ;;  %v1457_v23 = vadd.f32 %v3075_v11, %v1436_v58  ;;  %v1435_v14 = vadd.f32 %v1419_v22, %v2945_v32 }
 0x617   :  { %1473 = vst [vmem:[%s3178_s7 + $0x78] sm:$0xff] %v1457_v23  ;;  %v1456_v53 = vadd.f32 %v3075_v11, %v1435_v14 }
 0x619   :  { %1472 = vst [vmem:[%s3178_s7 + $0x70] sm:$0xff] %v1456_v53 }

</bundles_post_ra>
